<compile_context>
chip_gen: v7x
topology: tpu7x:2x2x1
jax: 0.10.0
libtpu: 0.0.40
codegen_flags: <defaults>
</compile_context>

<pallas_src>
import math

import jax
import jax.numpy as jnp
from jax.experimental import pallas as pl
from jax.experimental.pallas import tpu as pltpu


# ---------------------------------------------------------------------------
# Pallas kernel: masked additive-attention pooling over the middle axis.
# ---------------------------------------------------------------------------
def _attn_pool_kernel(x_ref, m_ref, w1_ref, b1_ref, w2_ref, o_ref):
    # x_ref : (TG, Lp, D) f32      groups x padded-seq x features
    # m_ref : (TG, Lp, 1) f32      1 = keep, 0 = masked / padding
    # w1_ref: (D, H)   b1_ref: (1, H)   w2_ref: (1, H)
    # o_ref : (TG, D) f32
    x = x_ref[...]
    tg, lp, d = x.shape

    # scores: Linear -> tanh -> Linear(hidden, 1, bias=False)
    x2 = x.reshape(tg * lp, d)                       # Lp % 8 == 0 -> layout-free merge
    hid = jnp.tanh(
        jnp.dot(x2, w1_ref[...], preferred_element_type=jnp.float32)
        + b1_ref[...])                               # (TG*Lp, H)  MXU + EUP
    s = jnp.sum(hid * w2_ref[...], axis=-1,
                keepdims=True)                       # (TG*Lp, 1)  lane reduce (XLU)
    s = s.reshape(tg, lp, 1)                         # layout-free split (Lp % 8 == 0)

    # masked softmax over the pooled axis (matches masked_fill(mask == 0, -1e9)).
    s = jnp.where(m_ref[...] == 0.0, -1e9, s)
    s = s - jnp.max(s, axis=1, keepdims=True)
    p = jnp.exp(s)
    beta = p / jnp.sum(p, axis=1, keepdims=True)     # (TG, Lp, 1)

    # weighted sum over the pooled axis -> lane-dense (TG, D) store.
    o_ref[...] = jnp.sum(beta * x, axis=1)


# ---------------------------------------------------------------------------
# Wrapper: tiling / padding + pallas_call.
# ---------------------------------------------------------------------------
def _round_up(x, m):
    return ((x + m - 1) // m) * m


def _choose_tile_g(g, lp, d, max_tile_g):
    """Largest group-tile (multiple of 8) whose x-block fits a ~4 MiB VMEM budget."""
    per_group_bytes = lp * d * 4
    t = max(8, min(max_tile_g, (4 * 1024 * 1024) // max(per_group_bytes, 1)))
    t = max(8, (t // 8) * 8)
    return min(t, _round_up(g, 8))


def attention_pool(x, mask, w1, b1, w2, *, max_tile_g=512):
    """x: (G, L, D) f32, mask: (G, L) {1 keep, 0 drop} -> (G, D) f32."""
    g, l, d = x.shape
    h = w1.shape[1]

    lp = _round_up(max(l, 8), 8)                  # sublane-align the pooled axis
    tile_g = _choose_tile_g(g, lp, d, max_tile_g)
    gp = _round_up(g, tile_g)

    xp = jnp.pad(x.astype(jnp.float32), ((0, gp - g), (0, lp - l), (0, 0)))
    mp = jnp.pad(mask.astype(jnp.float32), ((0, gp - g), (0, lp - l)))[..., None]

    out = pl.pallas_call(
        _attn_pool_kernel,
        out_shape=jax.ShapeDtypeStruct((gp, d), jnp.float32),
        grid_spec=pltpu.PrefetchScalarGridSpec(
            num_scalar_prefetch=0,
            grid=(gp // tile_g,),
            in_specs=[
                pl.BlockSpec((tile_g, lp, d), lambda i: (i, 0, 0)),
                pl.BlockSpec((tile_g, lp, 1), lambda i: (i, 0, 0)),
                pl.BlockSpec((d, h), lambda i: (0, 0)),   # weights: constant block,
                pl.BlockSpec((1, h), lambda i: (0, 0)),   # ~33 KB total, stays in
                pl.BlockSpec((1, h), lambda i: (0, 0)),   # VMEM across the grid
            ],
            out_specs=pl.BlockSpec((tile_g, d), lambda i: (i, 0)),
        ),
        compiler_params=pltpu.CompilerParams(
            dimension_semantics=("parallel",),
            vmem_limit_bytes=48 * 1024 * 1024),
    )(xp, mp, w1, b1.reshape(1, h), w2.reshape(1, h))

    return out[:g]


def attention_aggregator(enc, mask, params, task):
    """enc: (B, K, L, D), mask: (B, K, L) -> (B, D) (default) or (B, L, D) ('HumanActivity')."""
    b, k, l, d = enc.shape
    if task == "HumanActivity":
        # rearrange 'b k l d -> b l k d' (and mask likewise); pool over K with mask.
        x = jnp.transpose(enc, (0, 2, 1, 3)).reshape(b * l, k, d)
        m = jnp.transpose(mask, (0, 2, 1)).reshape(b * l, k)
        out = attention_pool(x, m, *params["type"])
        return out.reshape(b, l, d)
    # default: pool over L (masked), then over K (no mask).
    x = enc.reshape(b * k, l, d)
    m = mask.reshape(b * k, l)
    pooled = attention_pool(x, m, *params["len"]).reshape(b, k, d)
    ones = jnp.ones((b, k), jnp.float32)
    return attention_pool(pooled, ones, *params["type"])


# ---------------------------------------------------------------------------
# Parameter init (mirrors nn.Linear defaults) and pure-JAX reference.
# ---------------------------------------------------------------------------
def init_attention_params(key, in_size, hidden_size):
    k1, k2, k3 = jax.random.split(key, 3)
    lim1 = 1.0 / math.sqrt(in_size)
    w1 = jax.random.uniform(k1, (in_size, hidden_size), jnp.float32, -lim1, lim1)
    b1 = jax.random.uniform(k2, (hidden_size,), jnp.float32, -lim1, lim1)
    lim2 = 1.0 / math.sqrt(hidden_size)
    w2 = jax.random.uniform(k3, (hidden_size,), jnp.float32, -lim2, lim2)
    return w1, b1, w2


def _attention_ref(x, mask, w1, b1, w2):
    s = jnp.tanh(x @ w1 + b1) @ w2.reshape(-1, 1)     # (..., L, 1)
    if mask is not None:
        s = jnp.where(mask[..., None] == 0.0, -1e9, s)
    beta = jax.nn.softmax(s, axis=-2)
    return jnp.sum(beta * x, axis=-2)


def attention_aggregator_ref(enc, mask, params, task):
    if task == "HumanActivity":
        x = jnp.transpose(enc, (0, 2, 1, 3))
        m = jnp.transpose(mask, (0, 2, 1))
        return _attention_ref(x, m, *params["type"])
    out = _attention_ref(enc, mask, *params["len"])
    return _attention_ref(out, None, *params["type"])


if __name__ == "__main__":
    jax.config.update("jax_default_matmul_precision", "highest")

    key = jax.random.PRNGKey(0)
    k_enc, k_mask, k_len, k_type = jax.random.split(key, 4)

    # Small shapes implied by the forward: [B, K, L, D] with D = dim * 2, hidden = dim.
    B, K, L, dim = 2, 4, 16, 64
    D, H = 2 * dim, dim

    enc = jax.random.normal(k_enc, (B, K, L, D), jnp.float32)
    mask = (jax.random.uniform(k_mask, (B, K, L)) > 0.3).astype(jnp.float32)
    mask = mask.at[..., 0].set(1.0)    # every (b, k) has at least one valid step
    mask = mask.at[:, 0, :].set(1.0)   # every (b, l) has at least one valid type

    params = {
        "len": init_attention_params(k_len, D, H),
        "type": init_attention_params(k_type, D, H),
    }

    # Default task path: pool over L, then over K  -> (B, D)
    out = attention_aggregator(enc, mask, params, task="Physionet")
    out = jax.block_until_ready(out)
    ref = attention_aggregator_ref(enc, mask, params, task="Physionet")
    assert out.shape == (B, D)
    assert jnp.allclose(out, ref, atol=5e-3, rtol=5e-3), "mismatch (default task)"

    # HumanActivity path: pool over K only -> (B, L, D)
    out_ha = attention_aggregator(enc, mask, params, task="HumanActivity")
    out_ha = jax.block_until_ready(out_ha)
    ref_ha = attention_aggregator_ref(enc, mask, params, task="HumanActivity")
    assert out_ha.shape == (B, L, D)
    assert jnp.allclose(out_ha, ref_ha, atol=5e-3, rtol=5e-3), "mismatch (HumanActivity)"

    print("KERNEL_OK")
</pallas_src>

<mosaic_0001>
module attributes {stable_mosaic.version = 11 : i64} {
  func.func @_attn_pool_kernel(%arg0: i32, %arg1: memref<8x16x128xf32, #tpu.memory_space<vmem>>, %arg2: memref<8x16x1xf32, #tpu.memory_space<vmem>>, %arg3: memref<128x64xf32, #tpu.memory_space<vmem>>, %arg4: memref<1x64xf32, #tpu.memory_space<vmem>>, %arg5: memref<1x64xf32, #tpu.memory_space<vmem>>, %arg6: memref<8x128xf32, #tpu.memory_space<vmem>>) attributes {dimension_semantics = [#tpu.dimension_semantics<parallel>], iteration_bounds = array<i64: 1>, scalar_prefetch = 0 : i64, scratch_operands = 0 : i64, tpu.core_type = #tpu.core_type<tc>, window_params = [{transform_indices = @transform_0, window_bounds = array<i64: 8, 16, 128>}, {transform_indices = @transform_1, window_bounds = array<i64: 8, 16, 1>}, {pipeline_mode = #tpu.pipeline_mode<synchronous>, transform_indices = @transform_2, window_bounds = array<i64: 128, 64>}, {pipeline_mode = #tpu.pipeline_mode<synchronous>, transform_indices = @transform_3, window_bounds = array<i64: 1, 64>}, {pipeline_mode = #tpu.pipeline_mode<synchronous>, transform_indices = @transform_4, window_bounds = array<i64: 1, 64>}, {transform_indices = @transform_5, window_bounds = array<i64: 8, 128>}]} {
    %c0 = arith.constant 0 : index
    %c0_0 = arith.constant 0 : index
    %c0_1 = arith.constant 0 : index
    %0 = vector.load %arg1[%c0, %c0_0, %c0_1] : memref<8x16x128xf32, #tpu.memory_space<vmem>>, vector<8x16x128xf32>
    %1 = vector.shape_cast %0 : vector<8x16x128xf32> to vector<128x128xf32>
    %c0_2 = arith.constant 0 : index
    %c0_3 = arith.constant 0 : index
    %2 = vector.load %arg3[%c0_2, %c0_3] : memref<128x64xf32, #tpu.memory_space<vmem>>, vector<128x64xf32>
    %cst = arith.constant dense<0.000000e+00> : vector<128x64xf32>
    %3 = tpu.matmul %1, %2, %cst {dimension_numbers = #tpu.dot_dimension_numbers<[1], [0], [0], [1], [0, 0, 1, 1], [], []>, precision = #tpu.contract_precision<fp32>} : vector<128x128xf32>, vector<128x64xf32>, vector<128x64xf32> -> vector<128x64xf32>
    %c0_4 = arith.constant 0 : index
    %c0_5 = arith.constant 0 : index
    %4 = vector.load %arg4[%c0_4, %c0_5] : memref<1x64xf32, #tpu.memory_space<vmem>>, vector<1x64xf32>
    %5 = vector.broadcast %4 : vector<1x64xf32> to vector<128x64xf32>
    %6 = arith.addf %3, %5 : vector<128x64xf32>
    %7 = math.tanh %6 : vector<128x64xf32>
    %c0_6 = arith.constant 0 : index
    %c0_7 = arith.constant 0 : index
    %8 = vector.load %arg5[%c0_6, %c0_7] : memref<1x64xf32, #tpu.memory_space<vmem>>, vector<1x64xf32>
    %9 = vector.broadcast %8 : vector<1x64xf32> to vector<128x64xf32>
    %10 = arith.mulf %7, %9 : vector<128x64xf32>
    %cst_8 = arith.constant dense<0.000000e+00> : vector<128xf32>
    %11 = vector.multi_reduction <add>, %10, %cst_8 [1] : vector<128x64xf32> to vector<128xf32>
    %12 = vector.shape_cast %11 : vector<128xf32> to vector<128x1xf32>
    %13 = vector.shape_cast %12 : vector<128x1xf32> to vector<8x16x1xf32>
    %c0_9 = arith.constant 0 : index
    %c0_10 = arith.constant 0 : index
    %c0_11 = arith.constant 0 : index
    %14 = vector.load %arg2[%c0_9, %c0_10, %c0_11] : memref<8x16x1xf32, #tpu.memory_space<vmem>>, vector<8x16x1xf32>
    %cst_12 = arith.constant 0.000000e+00 : f32
    %15 = vector.broadcast %cst_12 : f32 to vector<8x16x1xf32>
    %16 = arith.cmpf oeq, %14, %15 : vector<8x16x1xf32>
    %cst_13 = arith.constant -1.000000e+09 : f32
    %17 = vector.broadcast %cst_13 : f32 to vector<8x16x1xf32>
    %18 = arith.select %16, %17, %13 : vector<8x16x1xi1>, vector<8x16x1xf32>
    %cst_14 = arith.constant dense<0xFF800000> : vector<8x1xf32>
    %19 = vector.multi_reduction <maximumf>, %18, %cst_14 [1] : vector<8x16x1xf32> to vector<8x1xf32>
    %20 = vector.shape_cast %19 : vector<8x1xf32> to vector<8x1x1xf32>
    %21 = vector.broadcast %20 : vector<8x1x1xf32> to vector<8x16x1xf32>
    %22 = arith.subf %18, %21 : vector<8x16x1xf32>
    %23 = math.exp %22 : vector<8x16x1xf32>
    %cst_15 = arith.constant dense<0.000000e+00> : vector<8x1xf32>
    %24 = vector.multi_reduction <add>, %23, %cst_15 [1] : vector<8x16x1xf32> to vector<8x1xf32>
    %25 = vector.shape_cast %24 : vector<8x1xf32> to vector<8x1x1xf32>
    %26 = vector.broadcast %25 : vector<8x1x1xf32> to vector<8x16x1xf32>
    %27 = arith.divf %23, %26 : vector<8x16x1xf32>
    %28 = vector.broadcast %27 : vector<8x16x1xf32> to vector<8x16x128xf32>
    %29 = arith.mulf %28, %0 : vector<8x16x128xf32>
    %cst_16 = arith.constant dense<0.000000e+00> : vector<8x128xf32>
    %30 = vector.multi_reduction <add>, %29, %cst_16 [1] : vector<8x16x128xf32> to vector<8x128xf32>
    %c0_17 = arith.constant 0 : index
    %c0_18 = arith.constant 0 : index
    %31 = vector.load %arg6[%c0_17, %c0_18] : memref<8x128xf32, #tpu.memory_space<vmem>>, vector<8x128xf32>
    tpu.vector_store %arg6[%c0_17, %c0_18], %30 {strides = array<i32>} : memref<8x128xf32, #tpu.memory_space<vmem>>, vector<8x128xf32>,
    return
  }
  func.func @transform_0(%arg0: i32) -> (i32, i32, i32) {
    %c0_i32 = arith.constant 0 : i32
    %c0_i32_0 = arith.constant 0 : i32
    %c0_i32_1 = arith.constant 0 : i32
    return %arg0, %c0_i32, %c0_i32_0 : i32, i32, i32
  }
  func.func @transform_1(%arg0: i32) -> (i32, i32, i32) {
    %c0_i32 = arith.constant 0 : i32
    %c0_i32_0 = arith.constant 0 : i32
    %c0_i32_1 = arith.constant 0 : i32
    return %arg0, %c0_i32, %c0_i32_0 : i32, i32, i32
  }
  func.func @transform_2(%arg0: i32) -> (i32, i32) {
    %c0_i32 = arith.constant 0 : i32
    %c0_i32_0 = arith.constant 0 : i32
    %c0_i32_1 = arith.constant 0 : i32
    return %c0_i32, %c0_i32_0 : i32, i32
  }
  func.func @transform_3(%arg0: i32) -> (i32, i32) {
    %c0_i32 = arith.constant 0 : i32
    %c0_i32_0 = arith.constant 0 : i32
    %c0_i32_1 = arith.constant 0 : i32
    return %c0_i32, %c0_i32_0 : i32, i32
  }
  func.func @transform_4(%arg0: i32) -> (i32, i32) {
    %c0_i32 = arith.constant 0 : i32
    %c0_i32_0 = arith.constant 0 : i32
    %c0_i32_1 = arith.constant 0 : i32
    return %c0_i32, %c0_i32_0 : i32, i32
  }
  func.func @transform_5(%arg0: i32) -> (i32, i32) {
    %c0_i32 = arith.constant 0 : i32
    %c0_i32_0 = arith.constant 0 : i32
    return %arg0, %c0_i32 : i32, i32
  }
}

</mosaic_0001>

<bundles_post_ra>
// kernel: tpu_custom_call.1
= control target key start
LH: loop header
LB: loop body
LE: loop exit
PB: predicated region body
PF: predicated region fallthrough
CT: control target
= control target key end

     0   :  { %s3806_s0 = inlined_call_operand.vmem [shape: f32[8,16,128], index: 0, kind: input, shape index: {}]   ;;  %s3807_s1 = inlined_call_operand.vmem [shape: f32[8,16,1], index: 1, kind: input, shape index: {}]   ;;  %s3808_s2 = inlined_call_operand.vmem [shape: f32[128,64], index: 2, kind: input, shape index: {}]   ;;  %s3809_s3 = inlined_call_operand.vmem [shape: f32[1,64], index: 3, kind: input, shape index: {}]   ;;  %s3810_s4 = inlined_call_operand.vmem [shape: f32[1,64], index: 4, kind: input, shape index: {}]   ;;  %s3811_s5 = inlined_call_operand.hbm [shape: f32[8,128], index: 5, kind: output, shape index: {}]  }
   0x1   :  { %v37_v0 = vld [vmem:[%s3808_s2] sm:$0xff]  ;;  %v38_v1 = vld [vmem:[%s3808_s2 + $0x8] sm:$0xff]  ;;  %v39_v2 = vld [vmem:[%s3808_s2 + $0x10] sm:$0xff] }
   0x2   :  { %v61_v3 = vand.u32 4294901760, %v37_v0  ;;  %v64_v4 = vand.u32 4294901760, %v38_v1  ;;  %v40_v5 = vld [vmem:[%s3808_s2 + $0x18] sm:$0xff]  ;;  %v67_v6 = vand.u32 4294901760, %v39_v2  ;;  %v2878_v7 = vld [vmem:[%s3808_s2 + $0x20] sm:$0xff]  ;;  %v2883_v8 = vld [vmem:[%s3808_s2 + $0x28] sm:$0xff] }
   0x3   :  { %v70_v9 = vand.u32 4294901760, %v40_v5  ;;  %v73_v11 = vand.u32 4294901760, %v2878_v7  ;;  %v76_v12 = vand.u32 4294901760, %v2883_v8  ;;  %v2894_v14 = vld [vmem:[%s3808_s2 + $0x30] sm:$0xff]  ;;  %v2899_v15 = vld [vmem:[%s3808_s2 + $0x38] sm:$0xff]  ;;  %v21_v16 = vld [vmem:[%s3806_s0] sm:$0xff] }
   0x4   :  { %v2885_v10 = vpack.c.bf16 %v64_v4, %v61_v3  ;;  %v2908_v17 = vand.u32 4294901760, %v21_v16  ;;  %v79_v19 = vand.u32 4294901760, %v2894_v14  ;;  %v82_v20 = vand.u32 4294901760, %v2899_v15  ;;  %v22_v21 = vld [vmem:[%s3806_s0 + $0x8] sm:$0xff]  ;;  %v2926_v22 = vld [vmem:[%s3808_s2 + $0x40] sm:$0xff]  ;;  %v2954_v30 = vld [vmem:[%s3808_s2 + $0x50] sm:$0xff] }
   0x5   :  { %v2889_v13 = vpack.c.bf16 %v70_v9, %v67_v6  ;;  %v2916_v18 = vpack.c.bf16 %v76_v12, %v73_v11  ;;  %v2931_v23 = vld [vmem:[%s3808_s2 + $0x48] sm:$0xff]  ;;  %v2939_v26 = vand.u32 4294901760, %v22_v21  ;;  %v3822_v28 = vand.u32 4294901760, %v2926_v22  ;;  %v23_v31 = vld [vmem:[%s3806_s0 + $0x10] sm:$0xff] }
   0x6   :  { %2420 = vmatprep.subr.bf16.mxu1 %v2885_v10  ;;  %2516 = vmatprep.subr.bf16.mxu0 %v2885_v10  ;;  %v2934_v24 = vsub.f32 %v21_v16, %v2908_v17  ;;  %v2947_v27 = vpack.c.bf16 %v82_v20, %v79_v19  ;;  %v3820_v29 = vand.u32 4294901760, %v2931_v23 }
   0x7   :  { %2422 = vmatpush3.bf16.msra.mxu1 %v2885_v10  ;;  %2518 = vmatpush3.bf16.msra.mxu0 %v2885_v10 }
   0x8   :  { %2424 = vmatprep.subr.bf16.mxu1 %v2889_v13  ;;  %2520 = vmatprep.subr.bf16.mxu0 %v2889_v13  ;;  %3855 = vst [vmem:[#allocation5_spill] sm:$0xff] %v2934_v24  ;;  %v143_v25 = vand.u32 4294901760, %v2934_v24  ;;  %3856 = vst [vmem:[#allocation6_spill] sm:$0xff] %v2947_v27 }
   0xb   :  { %2426 = vmatpush3.bf16.msra.mxu1 %v2889_v13  ;;  %2522 = vmatpush3.bf16.msra.mxu0 %v2889_v13 }
   0xc   :  { %2428 = vmatprep.subr.bf16.mxu1 %v2916_v18  ;;  %2524 = vmatprep.subr.bf16.mxu0 %v2916_v18 }
   0xd   :  { %10 = vsyncpa [#allocation3], 0  ;;  %v2962_v32 = vld [vmem:[%s3808_s2 + $0x58] sm:$0xff]  ;;  %v144_v33 = vsub.f32 %v2934_v24, %v143_v25  ;;  %2283 = vmatprep.mubr.f32.mxu0 %v143_v25  ;;  %v2968_v35 = vsub.f32 %v37_v0, %v61_v3  ;;  %v2970_v36 = vsub.f32 %v38_v1, %v64_v4  ;;  %v3819_v37 = vand.u32 4294901760, %v2954_v30  ;;  %v2978_v38 = vld [vmem:[%s3808_s2 + $0x60] sm:$0xff] }
   0xe   :  { %v24_v34 = vld [vmem:[%s3806_s0 + $0x18] sm:$0xff]  ;;  %v2983_v39 = vld [vmem:[%s3808_s2 + $0x68] sm:$0xff]  ;;  %v2986_v41 = vsub.f32 %v22_v21, %v2939_v26  ;;  %v2988_v42 = vand.u32 4294901760, %v23_v31  ;;  %v2996_v43 = vpack.c.bf16 %v3820_v29, %v3822_v28  ;;  %v3817_v44 = vand.u32 4294901760, %v2962_v32  ;;  %v3002_v45 = vld [vmem:[%s3808_s2 + $0x70] sm:$0xff] }
   0xf   :  { %2430 = vmatpush3.bf16.msra.mxu1 %v2916_v18  ;;  %2526 = vmatpush3.bf16.msra.mxu0 %v2916_v18  ;;  %v145_v40 = vand.u32 4294901760, %v144_v33  ;;  %v3007_v46 = vld [vmem:[%s3808_s2 + $0x78] sm:$0xff]  ;;  %v3009_v47 = vand.u32 4294901760, %v24_v34  ;;  %v3011_v48 = vsub.f32 %v39_v2, %v67_v6  ;;  %v3013_v49 = vsub.f32 %v40_v5, %v70_v9  ;;  %v25_v50 = vld [vmem:[%s3806_s0 + $0x20] sm:$0xff]  ;;  %v26_v55 = vld [vmem:[%s3806_s0 + $0x28] sm:$0xff] }
  0x10   :  { %3857 = vst [vmem:[#allocation7_spill] sm:$0xff] %v2986_v41  ;;  %2432 = vmatprep.subr.bf16.mxu1 %v2947_v27  ;;  %2528 = vmatprep.subr.bf16.mxu0 %v2947_v27  ;;  %3858 = vst [vmem:[#allocation8_spill] sm:$0xff] %v2996_v43  ;;  %v3815_v51 = vand.u32 4294901760, %v2978_v38  ;;  %v3814_v52 = vand.u32 4294901760, %v2983_v39  ;;  %v304_v53 = vand.u32 4294901760, %v2968_v35  ;;  %v311_v54 = vand.u32 4294901760, %v2970_v36 }
  0x11   :  { %2115 = vmatprep.mubr.f32.mxu1 %v145_v40  ;;  %v3813_v56 = vand.u32 4294901760, %v3002_v45  ;;  %v3812_v57 = vand.u32 4294901760, %v3007_v46  ;;  %v3816_v58 = vand.u32 4294901760, %v2986_v41  ;;  %v3031_v59 = vsub.f32 %v23_v31, %v2988_v42  ;;  %v27_v2 = vld [vmem:[%s3806_s0 + $0x30] sm:$0xff]  ;;  %v28_v9 = vld [vmem:[%s3806_s0 + $0x38] sm:$0xff] }
  0x12   :  { %v3039_v60 = vpack.c.bf16 %v3817_v44, %v3819_v37  ;;  %v3042_v61 = vsub.f32 %v24_v34, %v3009_v47  ;;  %v318_v62 = vand.u32 4294901760, %v3011_v48  ;;  %v3045_v63 = vand.u32 4294901760, %v25_v50 }
  0x13   :  { %2434 = vmatpush3.bf16.msra.mxu1 %v2947_v27  ;;  %2530 = vmatpush3.bf16.msra.mxu0 %v2947_v27  ;;  %3859 = vst [vmem:[#allocation9_spill] sm:$0xff] %v3031_v59  ;;  %v325_v0 = vand.u32 4294901760, %v3013_v49  ;;  %v3048_v1 = vand.u32 4294901760, %v26_v55  ;;  %v305_v3 = vsub.f32 %v2968_v35, %v304_v53  ;;  %v312_v4 = vsub.f32 %v2970_v36, %v311_v54 }
  0x14   :  { %2436 = vmatprep.subr.bf16.mxu1 %v2996_v43  ;;  %2532 = vmatprep.subr.bf16.mxu0 %v2996_v43  ;;  %3860 = vst [vmem:[#allocation10_spill] sm:$0xff] %v3039_v60  ;;  %3861 = vst [vmem:[#allocation11_spill] sm:$0xff] %v3042_v61  ;;  %v3058_v5 = vsub.f32 %v2878_v7, %v73_v11  ;;  %v3063_v6 = vsub.f32 %v2883_v8, %v76_v12  ;;  %v3818_v11 = vand.u32 4294901760, %v3031_v59  ;;  %vm1385_vm0 = vcmask 523264  }
  0x15   :  { %v3074_v16 = vpack.c.bf16 %v3814_v52, %v3815_v51  ;;  %v3080_v7 = vpack.c.bf16 %v3812_v57, %v3813_v56  ;;  %v3085_v8 = vsub.f32 %v2986_v41, %v3816_v58  ;;  %v3821_v12 = vand.u32 4294901760, %v3042_v61 }
  0x16   :  { %v319_v21 = vsub.f32 %v3011_v48, %v318_v62  ;;  %v3093_v25 = vsub.f32 %v25_v50, %v3045_v63  ;;  %v3095_v31 = vand.u32 4294901760, %v27_v2  ;;  %v326_v33 = vsub.f32 %v3013_v49, %v325_v0 }
  0x17   :  { %2438 = vmatpush3.bf16.msra.mxu1 %v2996_v43  ;;  %2534 = vmatpush3.bf16.msra.mxu0 %v2996_v43  ;;  %3862 = vst [vmem:[#allocation12_spill] sm:$0xff] %v3074_v16  ;;  %3863 = vst [vmem:[#allocation13_spill] sm:$0xff] %v3080_v7  ;;  %v3099_v34 = vsub.f32 %v26_v55, %v3048_v1  ;;  %v3101_v40 = vand.u32 4294901760, %v28_v9  ;;  %v3106_v57 = vsub.f32 %v2894_v14, %v79_v19  ;;  %v29_v19 = vld [vmem:[%s3806_s0 + $0x40] sm:$0xff]  ;;  %vm1482_vm3 = vcmask 7168  }
  0x18   :  { %2440 = vmatprep.subr.bf16.mxu1 %v3039_v60  ;;  %2536 = vmatprep.subr.bf16.mxu0 %v3039_v60  ;;  %3864 = vst [vmem:[#allocation14_spill] sm:$0xff] %v3093_v25  ;;  %3865 = vst [vmem:[#allocation15_spill] sm:$0xff] %v3095_v31  ;;  %v306_v56 = vand.u32 4294901760, %v305_v3  ;;  %v313_v52 = vand.u32 4294901760, %v312_v4  ;;  %v332_v51 = vand.u32 4294901760, %v3058_v5  ;;  %v339_v50 = vand.u32 4294901760, %v3063_v6 }
  0x19   :  { %3866 = vst [vmem:[#allocation16_spill] sm:$0xff] %v3099_v34  ;;  %3867 = vst [vmem:[#allocation17_spill] sm:$0xff] %v3101_v40  ;;  %v155_v55 = vand.u32 4294901760, %v3085_v8  ;;  %v3113_v58 = vpack.c.bf16 %v311_v54, %v304_v53  ;;  %v3118_v44 = vsub.f32 %v3031_v59, %v3818_v11  ;;  %v3123_v14 = vsub.f32 %v2899_v15, %v82_v20 }
  0x1a   :  { %v3133_v53 = vsub.f32 %v3042_v61, %v3821_v12  ;;  %v320_v54 = vand.u32 4294901760, %v319_v21  ;;  %v3826_v3 = vand.u32 4294901760, %v3093_v25  ;;  %v3137_v4 = vsub.f32 %v27_v2, %v3095_v31 }
  0x1b   :  { %2442 = vmatpush3.bf16.msra.mxu1 %v3039_v60  ;;  %2538 = vmatpush3.bf16.msra.mxu0 %v3039_v60  ;;  %v327_v15 = vand.u32 4294901760, %v326_v33  ;;  %v3141_v8 = vsub.f32 %v28_v9, %v3101_v40  ;;  %v2451_v37 = vpack.c.bf16 %v313_v52, %v306_v56  ;;  %v333_v29 = vsub.f32 %v3058_v5, %v332_v51  ;;  %v30_v9 = vld [vmem:[%s3806_s0 + $0x48] sm:$0xff] }
  0x1c   :  { %2444 = vmatprep.subr.bf16.mxu1 %v3074_v16  ;;  %2540 = vmatprep.subr.bf16.mxu0 %v3074_v16  ;;  %3868 = vst [vmem:[#allocation18_spill] sm:$0xff] %v3137_v4  ;;  %v340_v12 = vsub.f32 %v3063_v6, %v339_v50  ;;  %v3146_v28 = vand.u32 4294901760, %v29_v19  ;;  %v165_v2 = vand.u32 4294901760, %v3118_v44  ;;  %v353_v21 = vand.u32 4294901760, %v3123_v14 }
  0x1d   :  { %3869 = vst [vmem:[#allocation19_spill] sm:$0xff] %v3141_v8  ;;  %v3871_v52 = vand.u32 4294901760, %v2926_v22  ;;  %v3872_v33 = vand.u32 4294901760, %v2931_v23  ;;  %v175_v44 = vand.u32 4294901760, %v3133_v53  ;;  %v2551_v20 = vpack.c.bf16 %v325_v0, %v318_v62 }
  0x1e   :  { %3870 = vst [vmem:[#allocation20_spill] sm:$0xff] %v3146_v28  ;;  %v3171_v24 = vsub.f32 %v3093_v25, %v3826_v3  ;;  %v3874_v62 = vand.u32 4294901760, %v3106_v57  ;;  %v334_v3 = vand.u32 4294901760, %v333_v29  ;;  %v341_v60 = vand.u32 4294901760, %v340_v12  ;;  %v32_v29 = vld [vmem:[%s3806_s0 + $0x58] sm:$0xff] }
  0x1f   :  { %2446 = vmatpush3.bf16.msra.mxu1 %v3074_v16  ;;  %2542 = vmatpush3.bf16.msra.mxu0 %v3074_v16  ;;  %v3158_v56 = vsub.f32 %v2926_v22, %v3871_v52  ;;  %v3163_v11 = vsub.f32 %v2931_v23, %v3872_v33  ;;  %v31_v52 = vld [vmem:[%s3806_s0 + $0x50] sm:$0xff]  ;;  %v2455_v23 = vpack.c.bf16 %v327_v15, %v320_v54  ;;  %v3873_v33 = vand.u32 4294901760, %v3099_v34 }
  0x20   :  { %2448 = vmatprep.subr.bf16.mxu1 %v3080_v7  ;;  %2544 = vmatprep.subr.bf16.mxu0 %v3080_v7  ;;  %v347_v0 = vsub.f32 %v3106_v57, %v3874_v62  ;;  %v3187_v22 = vsub.f32 %v29_v19, %v3146_v28  ;;  %v3189_v43 = vand.u32 4294901760, %v30_v9  ;;  %v354_v54 = vsub.f32 %v3123_v14, %v353_v21 }
  0x21   :  { %v3180_v16 = vsub.f32 %v3099_v34, %v3873_v33  ;;  %v3196_v53 = vand.u32 4294901760, %v31_v52  ;;  %v185_v12 = vand.u32 4294901760, %v3171_v24  ;;  %v3203_v19 = vpack.c.bf16 %v339_v50, %v332_v51 }
  0x22   :  { %v3875_v62 = vand.u32 4294901760, %v3137_v4  ;;  %v3876_v33 = vand.u32 4294901760, %v2954_v30  ;;  %v3877_v40 = vand.u32 4294901760, %v3141_v8  ;;  %v348_v24 = vand.u32 4294901760, %v347_v0 }
  0x23   :  { %2450 = vmatpush3.bf16.msra.mxu1 %v3080_v7  ;;  %2546 = vmatpush3.bf16.msra.mxu0 %v3080_v7  ;;  %v195_v28 = vand.u32 4294901760, %v3180_v16  ;;  %v3878_v51 = vand.u32 4294901760, %v2962_v32  ;;  %v2459_v16 = vpack.c.bf16 %v341_v60, %v334_v3  ;;  %v3235_v0 = vand.u32 4294901760, %v32_v29  ;;  %v34_v3 = vld [vmem:[%s3806_s0 + $0x68] sm:$0xff] }
  0x24   :  { %2452 = vmatprep.subr.bf16.mxu1 %v2451_v37  ;;  %2548 = vmatprep.subr.bf16.mxu0 %v3113_v58  ;;  %v3208_v7 = vsub.f32 %v3137_v4, %v3875_v62  ;;  %v3213_v15 = vsub.f32 %v2954_v30, %v3876_v33  ;;  %v3219_v27 = vsub.f32 %v3141_v8, %v3877_v40  ;;  %v33_v62 = vld [vmem:[%s3806_s0 + $0x60] sm:$0xff]  ;;  %v3879_v30 = vand.u32 4294901760, %v2986_v41 }
  0x25   :  { %v3224_v50 = vsub.f32 %v2962_v32, %v3878_v51  ;;  %v3233_v40 = vsub.f32 %v30_v9, %v3189_v43  ;;  %v355_v32 = vand.u32 4294901760, %v354_v54  ;;  %v3880_v51 = vand.u32 4294901760, %v3158_v56 }
  0x26   :  { %2116 = vmatmul.mubr.f32.vlgmr.msra.gmra.mrb[0].mxu1 %v155_v55  ;;  %2284 = vmatmul.mubr.f32.vlgmr.msra.gmra.mrb[0].mxu0 %v3879_v30  ;;  %v3881_v55 = vand.u32 4294901760, %v3163_v11  ;;  %v3245_v60 = vsub.f32 %v31_v52, %v3196_v53  ;;  %v3254_v54 = vand.u32 4294901760, %v33_v62  ;;  %v215_v52 = vand.u32 4294901760, %v3219_v27 }
  0x27   :  { %2454 = vmatpush3.bf16.msra.mxu1 %v2451_v37  ;;  %2550 = vmatpush3.bf16.msra.mxu0 %v3113_v58  ;;  %v361_v31 = vsub.f32 %v3158_v56, %v3880_v51  ;;  %v3882_v37 = vand.u32 4294901760, %v3031_v59  ;;  %v205_v58 = vand.u32 4294901760, %v3208_v7  ;;  %v3883_v51 = vand.u32 4294901760, %v2978_v38  ;;  %v35_v59 = vld [vmem:[%s3806_s0 + $0x70] sm:$0xff] }
  0x28   :  { %v368_v30 = vsub.f32 %v3163_v11, %v3881_v55  ;;  %2118 = vmatprep.mubr.f32.mxu1 %v165_v2  ;;  %2456 = vmatprep.subr.bf16.mxu1 %v2455_v23  ;;  %v3884_v2 = vand.u32 4294901760, %v3106_v57  ;;  %v3885_v7 = vand.u32 4294901760, %v2983_v39  ;;  %v3887_v27 = vand.u32 4294901760, %v3187_v22 }
  0x29   :  { %2286 = vmatprep.mubr.f32.mxu0 %v3882_v37  ;;  %v3259_v55 = vsub.f32 %v2978_v38, %v3883_v51  ;;  %2552 = vmatprep.subr.bf16.mxu0 %v2551_v20  ;;  %v3886_v38 = vand.u32 4294901760, %v3042_v61  ;;  %v3282_v37 = vand.u32 4294901760, %v34_v3 }
  0x2a   :  { %v2559_v33 = vpack.c.bf16 %v353_v21, %v3884_v2  ;;  %v3268_v9 = vsub.f32 %v2983_v39, %v3885_v7  ;;  %2119 = vmatmul.mubr.f32.gmra.mrb[2].mxu1 %v175_v44  ;;  %v224_v51 = vsub.f32 %v3187_v22, %v3887_v27  ;;  %v3280_v2 = vsub.f32 %v32_v29, %v3235_v0 }
  0x2b   :  { %2287 = vmatmul.mubr.f32.gmra.mrb[2].mxu0 %v3886_v38  ;;  %3889 = vst [vmem:[#allocation22_spill] sm:$0xff] %v3282_v37  ;;  %2458 = vmatpush3.bf16.msra.mxu1 %v2455_v23  ;;  %v2463_v39 = vpack.c.bf16 %v355_v32, %v348_v24  ;;  %v362_v7 = vand.u32 4294901760, %v361_v31  ;;  %v369_v41 = vand.u32 4294901760, %v368_v30  ;;  %v36_v38 = vld [vmem:[%s3806_s0 + $0x78] sm:$0xff]  ;;  %v3890_v27 = vand.u32 4294901760, %v3093_v25 }
  0x2c   :  { %3888 = vst [vmem:[#allocation21_spill] sm:$0xff] %v3280_v2  ;;  %2554 = vmatpush3.bf16.msra.mxu0 %v2551_v20  ;;  %2121 = vmatprep.mubr.f32.mxu1 %v185_v12  ;;  %v3891_v29 = vand.u32 4294901760, %v3213_v15  ;;  %v3294_v23 = vsub.f32 %v33_v62, %v3254_v54  ;;  %v3297_v20 = vand.u32 4294901760, %v35_v59  ;;  %v3894_v24 = vand.u32 4294901760, %v3224_v50 }
  0x2d   :  { %2289 = vmatprep.mubr.f32.mxu0 %v3890_v27  ;;  %2460 = vmatprep.subr.bf16.mxu1 %v2459_v16  ;;  %v395_v32 = vand.u32 4294901760, %v3268_v9  ;;  %v3895_v30 = vand.u32 4294901760, %v3002_v45  ;;  %v3896_v62 = vand.u32 4294901760, %v3007_v46  ;;  %v3897_v31 = vand.u32 4294901760, %v3099_v34 }
  0x2e   :  { %v375_v21 = vsub.f32 %v3213_v15, %v3891_v29  ;;  %3892 = vst [vmem:[#allocation23_spill] sm:$0xff] %v3294_v23  ;;  %3893 = vst [vmem:[#allocation24_spill] sm:$0xff] %v3297_v20  ;;  %2556 = vmatprep.subr.bf16.mxu0 %v3203_v19  ;;  %v382_v12 = vsub.f32 %v3224_v50, %v3894_v24  ;;  %2122 = vmatmul.mubr.f32.gmra.mrb[4].mxu1 %v195_v28  ;;  %v3898_v44 = vand.u32 4294901760, %v3233_v40 }
  0x2f   :  { %v3307_v27 = vsub.f32 %v3002_v45, %v3895_v30  ;;  %v3312_v29 = vsub.f32 %v3007_v46, %v3896_v62  ;;  %2290 = vmatmul.mubr.f32.gmra.mrb[4].mxu0 %v3897_v31  ;;  %v253_v25 = vand.u32 4294901760, %v3280_v2  ;;  %v3321_v61 = vsub.f32 %v34_v3, %v3282_v37  ;;  %2462 = vmatpush3.bf16.msra.mxu1 %v2459_v16 }
  0x30   :  { %v234_v24 = vsub.f32 %v3233_v40, %v3898_v44  ;;  %v3323_v45 = vand.u32 4294901760, %v36_v38  ;;  %2558 = vmatpush3.bf16.msra.mxu0 %v3203_v19  ;;  %v225_v46 = vand.u32 4294901760, %v224_v51  ;;  %v2467_v30 = vpack.c.bf16 %v369_v41, %v362_v7  ;;  %2124 = vmatprep.mubr.f32.mxu1 %v205_v58 }
  0x31   :  { %3899 = vst [vmem:[#allocation25_spill] sm:$0xff] %v3321_v61  ;;  %v3900_v28 = vand.u32 4294901760, %v3158_v56  ;;  %v3901_v31 = vand.u32 4294901760, %v3163_v11  ;;  %v3902_v34 = vand.u32 4294901760, %v3245_v60  ;;  %v3903_v3 = vand.u32 4294901760, %v3137_v4  ;;  %2464 = vmatprep.subr.bf16.mxu1 %v2463_v39  ;;  %2560 = vmatprep.subr.bf16.mxu0 %v2559_v33 }
  0x32   :  { %v376_v37 = vand.u32 4294901760, %v375_v21  ;;  %v263_v16 = vand.u32 4294901760, %v3294_v23  ;;  %v3904_v19 = vand.u32 4294901760, %v3259_v55  ;;  %v3340_v51 = vsub.f32 %v35_v59, %v3297_v20  ;;  %2125 = vmatmul.mubr.f32.gmra.mrb[6].mxu1 %v215_v52 }
  0x33   :  { %v2563_v62 = vpack.c.bf16 %v3901_v31, %v3900_v28  ;;  %v244_v44 = vsub.f32 %v3245_v60, %v3902_v34  ;;  %2292 = vmatprep.mubr.f32.mxu0 %v3903_v3  ;;  %v383_v7 = vand.u32 4294901760, %v382_v12  ;;  %v396_v28 = vsub.f32 %v3268_v9, %v395_v32  ;;  %2466 = vmatpush3.bf16.msra.mxu1 %v2463_v39 }
  0x34   :  { %v389_v41 = vsub.f32 %v3259_v55, %v3904_v19  ;;  %v402_v34 = vand.u32 4294901760, %v3307_v27  ;;  %v409_v58 = vand.u32 4294901760, %v3312_v29  ;;  %v3905_v21 = vand.u32 4294901760, %v3141_v8  ;;  %2562 = vmatpush3.bf16.msra.mxu0 %v2559_v33  ;;  %2127 = vmatprep.mubr.f32.mxu1 %v225_v46 }
  0x35   :  { %v235_v31 = vand.u32 4294901760, %v234_v24  ;;  %v254_v3 = vsub.f32 %v3280_v2, %v253_v25  ;;  %v273_v19 = vand.u32 4294901760, %v3321_v61  ;;  %v3350_v59 = vsub.f32 %v36_v38, %v3323_v45  ;;  %2468 = vmatprep.subr.bf16.mxu1 %v2467_v30  ;;  %2564 = vmatprep.subr.bf16.mxu0 %v2563_v62 }
  0x36   :  { %2293 = vmatmul.mubr.f32.gmra.mrb[6].mxu0 %v3905_v21  ;;  %v245_v12 = vand.u32 4294901760, %v244_v44  ;;  %v3906_v4 = vand.u32 4294901760, %v3187_v22  ;;  %v3907_v52 = vand.u32 4294901760, %v3213_v15  ;;  %v3908_v8 = vand.u32 4294901760, %v3224_v50 }
  0x37   :  { %v264_v24 = vsub.f32 %v3294_v23, %v263_v16  ;;  %v390_v2 = vand.u32 4294901760, %v389_v41  ;;  %v283_v20 = vand.u32 4294901760, %v3340_v51  ;;  %v2471_v38 = vpack.c.bf16 %v383_v7, %v376_v37  ;;  %2128 = vmatmul.mubr.f32.gmra.mrb[8].mxu1 %v235_v31 }
  0x38   :  { %2295 = vmatprep.mubr.f32.mxu0 %v3906_v4  ;;  %v2567_v21 = vpack.c.bf16 %v3908_v8, %v3907_v52  ;;  %v397_v39 = vand.u32 4294901760, %v396_v28  ;;  %v403_v33 = vsub.f32 %v3307_v27, %v402_v34  ;;  %v410_v46 = vsub.f32 %v3312_v29, %v409_v58  ;;  %2470 = vmatpush3.bf16.msra.mxu1 %v2467_v30 }
  0x39   :  { %v3909_v4 = vand.u32 4294901760, %v3233_v40  ;;  %v255_v44 = vand.u32 4294901760, %v254_v3  ;;  %v274_v8 = vsub.f32 %v3321_v61, %v273_v19  ;;  %v293_v52 = vand.u32 4294901760, %v3350_v59  ;;  %2566 = vmatpush3.bf16.msra.mxu0 %v2563_v62  ;;  %2130 = vmatprep.mubr.f32.mxu1 %v245_v12 }
  0x3a   :  { %v3910_v41 = vand.u32 4294901760, %v3245_v60  ;;  %v265_v37 = vand.u32 4294901760, %v264_v24  ;;  %v284_v7 = vsub.f32 %v3340_v51, %v283_v20  ;;  %2472 = vmatprep.subr.bf16.mxu1 %v2471_v38  ;;  %2568 = vmatprep.subr.bf16.mxu0 %v2567_v21  ;;  %v2475_v28 = vpack.c.bf16 %v397_v39, %v390_v2 }
  0x3b   :  { %2296 = vmatmul.mubr.f32.gmra.mrb[8].mxu0 %v3909_v4  ;;  %v3911_v31 = vand.u32 4294901760, %v3259_v55  ;;  %v404_v3 = vand.u32 4294901760, %v403_v33  ;;  %v411_v23 = vand.u32 4294901760, %v410_v46  ;;  %2131 = vmatmul.mubr.f32.gmra.mrb[10].mxu1 %v255_v44  ;;  %v275_v61 = vand.u32 4294901760, %v274_v8 }
  0x3c   :  { %2298 = vmatprep.mubr.f32.mxu0 %v3910_v41  ;;  %v294_v30 = vsub.f32 %v3350_v59, %v293_v52  ;;  %2474 = vmatpush3.bf16.msra.mxu1 %v2471_v38  ;;  %v285_v62 = vand.u32 4294901760, %v284_v7  ;;  %v2575_v24 = vpack.c.bf16 %v409_v58, %v402_v34 }
  0x3d   :  { %v2571_v4 = vpack.c.bf16 %v395_v32, %v3911_v31  ;;  %2570 = vmatpush3.bf16.msra.mxu0 %v2567_v21  ;;  %2133 = vmatprep.mubr.f32.mxu1 %v265_v37  ;;  %v2479_v12 = vpack.c.bf16 %v411_v23, %v404_v3  ;;  %v3923_v23 = vld [vmem:[#allocation7_spill] sm:$0xff] }
  0x3e   :  { %2476 = vmatprep.subr.bf16.mxu1 %v2475_v28  ;;  %v295_v2 = vand.u32 4294901760, %v294_v30  ;;  %v3925_v32 = vld [vmem:[#allocation11_spill] sm:$0xff]  ;;  %v3483_v30 = vld [vmem:[%s3810_s4] ss:$0 sm:$0xff] }
  0x3f   :  { %2299 = vmatmul.mubr.f32.gmra.mrb[10].mxu0 %v253_v25  ;;  %2572 = vmatprep.subr.bf16.mxu0 %v2571_v4  ;;  %v2483_v25 = vpack.c.bf16 %v2970_v36, %v2968_v35  ;;  %v2491_v35 = vpack.c.bf16 %v3063_v6, %v3058_v5  ;;  %v3912_v36 = vld [vmem:[#allocation15_spill] sm:$0xff]  ;;  %v2503_v5 = vpack.c.bf16 %v3224_v50, %v3213_v15  ;;  %v3917_v6 = vld [vmem:[#allocation10_spill] sm:$0xff]  ;;  %v3920_v50 = vld [vmem:[#allocation24_spill] sm:$0xff] }
  0x40   :  { %2301 = vmatprep.mubr.f32.mxu0 %v263_v16  ;;  %2134 = vmatmul.mubr.f32.gmra.mrb[12].mxu1 %v275_v61  ;;  %v2487_v61 = vpack.c.bf16 %v3013_v49, %v3011_v48  ;;  %v2499_v48 = vpack.c.bf16 %v3163_v11, %v3158_v56  ;;  %v3914_v49 = vld [vmem:[#allocation17_spill] sm:$0xff]  ;;  %v2507_v11 = vpack.c.bf16 %v3268_v9, %v3259_v55  ;;  %v3919_v15 = vld [vmem:[#allocation22_spill] sm:$0xff] }
  0x41   :  { %2478 = vmatpush3.bf16.msra.mxu1 %v2475_v28  ;;  %2574 = vmatpush3.bf16.msra.mxu0 %v2571_v4  ;;  %v2511_v56 = vpack.c.bf16 %v3312_v29, %v3307_v27  ;;  %v3921_v9 = vld [vmem:[#allocation13_spill] sm:$0xff]  ;;  %v3926_v27 = vld [vmem:[#allocation14_spill] sm:$0xff]  ;;  %v3927_v29 = vld [vmem:[#allocation16_spill] sm:$0xff] }
  0x42   :  { %2136 = vmatprep.mubr.f32.mxu1 %v285_v62  ;;  %2480 = vmatprep.subr.bf16.mxu1 %v2479_v12  ;;  %v3922_v55 = vld [vmem:[#allocation5_spill] sm:$0xff] }
  0x43   :  { %2302 = vmatmul.mubr.f32.gmra.mrb[12].mxu0 %v273_v19  ;;  %2576 = vmatprep.subr.bf16.mxu0 %v2575_v24 }
  0x44   :  { %2304 = vmatprep.mubr.f32.mxu0 %v283_v20  ;;  %2137 = vmatmul.mubr.f32.gmra.mrb[14].mxu1 %v295_v2  ;;  %v3924_v20 = vld [vmem:[#allocation9_spill] sm:$0xff] }
  0x45   :  { %2482 = vmatpush3.bf16.msra.mxu1 %v2479_v12  ;;  %2578 = vmatpush3.bf16.msra.mxu0 %v2575_v24 }
  0x46   :  { %2171 = vmatprep.mubr.f32.mxu1 %v2908_v17  ;;  %2484 = vmatprep.subr.bf16.mxu1 %v2483_v25 }
  0x47   :  { %2305 = vmatmul.mubr.f32.gmra.mrb[14].mxu0 %v293_v52  ;;  %2580 = vmatprep.subr.bf16.mxu0 %v2885_v10 }
  0x48   :  { %2339 = vmatprep.mubr.f32.mxu0 %v2908_v17  ;;  %2172 = vmatmul.mubr.f32.vlgmr.msra.gmra.mrb[0].mxu1 %v2939_v26 }
  0x49   :  { %2486 = vmatpush3.bf16.msra.mxu1 %v2483_v25  ;;  %2174 = vmatprep.mubr.f32.mxu1 %v2988_v42 }
  0x4a   :  { %2488 = vmatprep.subr.bf16.mxu1 %v2487_v61 }
  0x4b   :  { %2340 = vmatmul.mubr.f32.vlgmr.msra.gmra.mrb[0].mxu0 %v2939_v26 }
  0x4c   :  { %2582 = vmatpush3.bf16.msra.mxu0 %v2885_v10  ;;  %2342 = vmatprep.mubr.f32.mxu0 %v2988_v42  ;;  %v2495_v10 = vpack.c.bf16 %v3123_v14, %v3106_v57  ;;  %v3915_v57 = vld [vmem:[#allocation20_spill] sm:$0xff] }
  0x4d   :  { %2584 = vmatprep.subr.bf16.mxu0 %v2889_v13  ;;  %2175 = vmatmul.mubr.f32.gmra.mrb[2].mxu1 %v3009_v47  ;;  %v3918_v14 = vld [vmem:[#allocation12_spill] sm:$0xff] }
  0x4e   :  { %2490 = vmatpush3.bf16.msra.mxu1 %v2487_v61  ;;  %2177 = vmatprep.mubr.f32.mxu1 %v3045_v63 }
  0x4f   :  { %2343 = vmatmul.mubr.f32.gmra.mrb[2].mxu0 %v3009_v47  ;;  %2492 = vmatprep.subr.bf16.mxu1 %v2491_v35 }
  0x50   :  { %2586 = vmatpush3.bf16.msra.mxu0 %v2889_v13  ;;  %2345 = vmatprep.mubr.f32.mxu0 %v3045_v63  ;;  %v3913_v13 = vld [vmem:[#allocation6_spill] sm:$0xff] }
  0x51   :  { %2588 = vmatprep.subr.bf16.mxu0 %v2916_v18  ;;  %2178 = vmatmul.mubr.f32.gmra.mrb[4].mxu1 %v3048_v1 }
  0x52   :  { %2494 = vmatpush3.bf16.msra.mxu1 %v2491_v35  ;;  %2180 = vmatprep.mubr.f32.mxu1 %v3912_v36 }
  0x53   :  { %2346 = vmatmul.mubr.f32.gmra.mrb[4].mxu0 %v3048_v1  ;;  %2496 = vmatprep.subr.bf16.mxu1 %v2495_v10 }
  0x54   :  { %2590 = vmatpush3.bf16.msra.mxu0 %v2916_v18  ;;  %2348 = vmatprep.mubr.f32.mxu0 %v3912_v36  ;;  %v3916_v18 = vld [vmem:[#allocation8_spill] sm:$0xff] }
  0x55   :  { %2592 = vmatprep.subr.bf16.mxu0 %v3913_v13  ;;  %2181 = vmatmul.mubr.f32.gmra.mrb[6].mxu1 %v3914_v49 }
  0x56   :  { %2498 = vmatpush3.bf16.msra.mxu1 %v2495_v10  ;;  %2183 = vmatprep.mubr.f32.mxu1 %v3915_v57 }
  0x57   :  { %2349 = vmatmul.mubr.f32.gmra.mrb[6].mxu0 %v3914_v49  ;;  %2500 = vmatprep.subr.bf16.mxu1 %v2499_v48 }
  0x58   :  { %2594 = vmatpush3.bf16.msra.mxu0 %v3913_v13  ;;  %2351 = vmatprep.mubr.f32.mxu0 %v3915_v57 }
  0x59   :  { %2596 = vmatprep.subr.bf16.mxu0 %v3916_v18  ;;  %2184 = vmatmul.mubr.f32.gmra.mrb[8].mxu1 %v3189_v43 }
  0x5a   :  { %2502 = vmatpush3.bf16.msra.mxu1 %v2499_v48  ;;  %2186 = vmatprep.mubr.f32.mxu1 %v3196_v53 }
  0x5b   :  { %2352 = vmatmul.mubr.f32.gmra.mrb[8].mxu0 %v3189_v43  ;;  %2504 = vmatprep.subr.bf16.mxu1 %v2503_v5 }
  0x5c   :  { %2598 = vmatpush3.bf16.msra.mxu0 %v3916_v18  ;;  %2354 = vmatprep.mubr.f32.mxu0 %v3196_v53 }
  0x5d   :  { %2600 = vmatprep.subr.bf16.mxu0 %v3917_v6  ;;  %2187 = vmatmul.mubr.f32.gmra.mrb[10].mxu1 %v3235_v0 }
  0x5e   :  { %2506 = vmatpush3.bf16.msra.mxu1 %v2503_v5  ;;  %2189 = vmatprep.mubr.f32.mxu1 %v3254_v54 }
  0x5f   :  { %2355 = vmatmul.mubr.f32.gmra.mrb[10].mxu0 %v3235_v0  ;;  %2508 = vmatprep.subr.bf16.mxu1 %v2507_v11 }
  0x60   :  { %2602 = vmatpush3.bf16.msra.mxu0 %v3917_v6  ;;  %2357 = vmatprep.mubr.f32.mxu0 %v3254_v54 }
  0x61   :  { %2604 = vmatprep.subr.bf16.mxu0 %v3918_v14  ;;  %2190 = vmatmul.mubr.f32.gmra.mrb[12].mxu1 %v3919_v15 }
  0x62   :  { %2510 = vmatpush3.bf16.msra.mxu1 %v2507_v11  ;;  %2192 = vmatprep.mubr.f32.mxu1 %v3920_v50 }
  0x63   :  { %2358 = vmatmul.mubr.f32.gmra.mrb[12].mxu0 %v3919_v15  ;;  %2512 = vmatprep.subr.bf16.mxu1 %v2511_v56 }
  0x64   :  { %2606 = vmatpush3.bf16.msra.mxu0 %v3918_v14  ;;  %2360 = vmatprep.mubr.f32.mxu0 %v3920_v50 }
  0x65   :  { %2608 = vmatprep.subr.bf16.mxu0 %v3921_v9  ;;  %2193 = vmatmul.mubr.f32.gmra.mrb[14].mxu1 %v3323_v45 }
  0x66   :  { %2514 = vmatpush3.bf16.msra.mxu1 %v2511_v56  ;;  %2227 = vmatprep.mubr.f32.mxu1 %v3922_v55 }
  0x67   :  { %2361 = vmatmul.mubr.f32.gmra.mrb[14].mxu0 %v3323_v45 }
  0x68   :  { %2610 = vmatpush3.bf16.msra.mxu0 %v3921_v9  ;;  %2395 = vmatprep.mubr.f32.mxu0 %v2908_v17  ;;  %v3928_v17 = vld [vmem:[#allocation18_spill] sm:$0xff] }
  0x69   :  { %2228 = vmatmul.mubr.f32.vlgmr.msra.gmra.mrb[0].mxu1 %v3923_v23 }
  0x6a   :  { %2230 = vmatprep.mubr.f32.mxu1 %v3924_v20 }
  0x6b   :  { %2396 = vmatmul.mubr.f32.vlgmr.msra.gmra.mrb[0].mxu0 %v2939_v26  ;;  %v3929_v26 = vld [vmem:[#allocation19_spill] sm:$0xff] }
  0x6c   :  { %2398 = vmatprep.mubr.f32.mxu0 %v2988_v42  ;;  %v3930_v42 = vld [vmem:[#allocation21_spill] sm:$0xff] }
  0x6d   :  { %2231 = vmatmul.mubr.f32.gmra.mrb[2].mxu1 %v3925_v32 }
  0x6e   :  { %2233 = vmatprep.mubr.f32.mxu1 %v3926_v27 }
  0x6f   :  { %2399 = vmatmul.mubr.f32.gmra.mrb[2].mxu0 %v3009_v47  ;;  %v3931_v47 = vld [vmem:[#allocation23_spill] sm:$0xff] }
  0x70   :  { %2401 = vmatprep.mubr.f32.mxu0 %v3045_v63  ;;  %v3932_v63 = vld [vmem:[#allocation25_spill] sm:$0xff] }
  0x71   :  { %2234 = vmatmul.mubr.f32.gmra.mrb[4].mxu1 %v3927_v29 }
  0x72   :  { %2236 = vmatprep.mubr.f32.mxu1 %v3928_v17 }
  0x73   :  { %2402 = vmatmul.mubr.f32.gmra.mrb[4].mxu0 %v3048_v1 }
  0x74   :  { %2404 = vmatprep.mubr.f32.mxu0 %v3912_v36 }
  0x75   :  { %2237 = vmatmul.mubr.f32.gmra.mrb[6].mxu1 %v3929_v26 }
  0x76   :  { %2239 = vmatprep.mubr.f32.mxu1 %v3187_v22 }
  0x77   :  { %2405 = vmatmul.mubr.f32.gmra.mrb[6].mxu0 %v3914_v49 }
  0x78   :  { %2407 = vmatprep.mubr.f32.mxu0 %v3915_v57 }
  0x79   :  { %2240 = vmatmul.mubr.f32.gmra.mrb[8].mxu1 %v3233_v40 }
  0x7a   :  { %2242 = vmatprep.mubr.f32.mxu1 %v3245_v60 }
  0x7b   :  { %2408 = vmatmul.mubr.f32.gmra.mrb[8].mxu0 %v3189_v43  ;;  %v3471_v43 = vld [vmem:[%s3809_s3] ss:$0 sm:$0xff] }
  0x7c   :  { %2410 = vmatprep.mubr.f32.mxu0 %v3196_v53 }
  0x7d   :  { %2243 = vmatmul.mubr.f32.gmra.mrb[10].mxu1 %v3930_v42 }
  0x7e   :  { %2245 = vmatprep.mubr.f32.mxu1 %v3931_v47 }
  0x7f   :  { %2411 = vmatmul.mubr.f32.gmra.mrb[10].mxu0 %v3235_v0 }
  0x80   :  { %2413 = vmatprep.mubr.f32.mxu0 %v3254_v54 }
  0x81   :  { %2246 = vmatmul.mubr.f32.gmra.mrb[12].mxu1 %v3932_v63 }
  0x82   :  { %2248 = vmatprep.mubr.f32.mxu1 %v3340_v51 }
  0x83   :  { %2414 = vmatmul.mubr.f32.gmra.mrb[12].mxu0 %v3919_v15 }
  0x84   :  { %2416 = vmatprep.mubr.f32.mxu0 %v3920_v50 }
  0x85   :  { %2249 = vmatmul.mubr.f32.gmra.mrb[14].mxu1 %v3350_v59 }
  0x87   :  { %2417 = vmatmul.mubr.f32.gmra.mrb[14].mxu0 %v3323_v45 }
 0x13c   :  { %v2229_v1 = vpop.f32.mrb[0].mxu1 }
 0x13d   :  { %v2611_v53 = vadd.f32 %v2229_v1, %v3471_v43  ;;  %v642_v40 = vpop.f32.mrb[1].mxu1 }
 0x13e   :  { %v2397_v22 = vpop.f32.mrb[0].mxu0  ;;  %v2613_v60 = vadd.f32 %v3471_v43, %v642_v40 }
 0x13f   :  { %v1252_v0 = vpop.f32.mrb[1].mxu0  ;;  %v2612_v54 = vadd.f32 %v2611_v53, %v2397_v22 }
 0x140   :  { %v2614_v16 = vadd.f32 %v2613_v60, %v1252_v0  ;;  %v2232_v51 = vpop.f32.mrb[2].mxu1 }
 0x141   :  { %2711 = vtanh.f32 %v2612_v54  ;;  %v2615_v45 = vadd.f32 %v2232_v51, %v3471_v43  ;;  %v656_v58 = vpop.f32.mrb[3].mxu1 }
 0x142   :  { %v2400_v34 = vpop.f32.mrb[2].mxu0  ;;  %2713 = vtanh.f32 %v2614_v16  ;;  %v2617_v59 = vadd.f32 %v3471_v43, %v656_v58 }
 0x143   :  { %v1264_v19 = vpop.f32.mrb[3].mxu0  ;;  %v2616_v21 = vadd.f32 %v2615_v45, %v2400_v34 }
 0x144   :  { %v2618_v38 = vadd.f32 %v2617_v59, %v1264_v19  ;;  %v2235_v39 = vpop.f32.mrb[4].mxu1 }
 0x145   :  { %2715 = vtanh.f32 %v2616_v21  ;;  %v2619_v46 = vadd.f32 %v2235_v39, %v3471_v43  ;;  %v670_v44 = vpop.f32.mrb[5].mxu1 }
 0x146   :  { %v2403_v33 = vpop.f32.mrb[4].mxu0  ;;  %2717 = vtanh.f32 %v2618_v38  ;;  %v2621_v52 = vadd.f32 %v3471_v43, %v670_v44 }
 0x147   :  { %v1276_v8 = vpop.f32.mrb[5].mxu0  ;;  %v2620_v41 = vadd.f32 %v2619_v46, %v2403_v33 }
 0x148   :  { %v2622_v37 = vadd.f32 %v2621_v52, %v1276_v8  ;;  %v2238_v7 = vpop.f32.mrb[6].mxu1 }
 0x149   :  { %2719 = vtanh.f32 %v2620_v41  ;;  %v2623_v31 = vadd.f32 %v2238_v7, %v3471_v43  ;;  %v684_v4 = vpop.f32.mrb[7].mxu1 }
 0x14a   :  { %v2406_v28 = vpop.f32.mrb[6].mxu0  ;;  %2721 = vtanh.f32 %v2622_v37  ;;  %v2625_v62 = vadd.f32 %v3471_v43, %v684_v4 }
 0x14b   :  { %v1288_v3 = vpop.f32.mrb[7].mxu0  ;;  %v2712_v12 = vpop.eup %2711  ;;  %v2624_v24 = vadd.f32 %v2623_v31, %v2406_v28 }
 0x14c   :  { %v2714_v2 = vpop.eup %2713  ;;  %v2626_v25 = vadd.f32 %v2625_v62, %v1288_v3  ;;  %v2241_v61 = vpop.f32.mrb[8].mxu1  ;;  %v1370_v10 = vmul.f32 %v2712_v12, %v3483_v30 }
 0x14d   :  { %2723 = vtanh.f32 %v2624_v24  ;;  %v2627_v36 = vadd.f32 %v2241_v61, %v3471_v43  ;;  %v698_v13 = vpop.f32.mrb[9].mxu1  ;;  %v1369_v49 = vmul.f32 %v2714_v2, %v3483_v30 }
 0x14e   :  { %v2409_v35 = vpop.f32.mrb[8].mxu0  ;;  %2725 = vtanh.f32 %v2626_v25  ;;  %v2629_v57 = vadd.f32 %v3471_v43, %v698_v13  ;;  %v1389_v18 = vsel %vm1385_vm0, %v1370_v10, 0.0 }
 0x14f   :  { %v1300_v48 = vpop.f32.mrb[9].mxu0  ;;  %v2716_v5 = vpop.eup %2715  ;;  %v2628_v6 = vadd.f32 %v2627_v36, %v2409_v35  ;;  %1390 = vadd.xlane.f32.xlu0 %v1389_v18  ;;  %v1386_v20 = vsel %vm1385_vm0, %v1369_v49, 0.0 }
 0x150   :  { %v2718_v11 = vpop.eup %2717  ;;  %v2630_v14 = vadd.f32 %v2629_v57, %v1300_v48  ;;  %v2244_v56 = vpop.f32.mrb[10].mxu1  ;;  %v1372_v50 = vmul.f32 %v2716_v5, %v3483_v30 }
 0x151   :  { %2727 = vtanh.f32 %v2628_v6  ;;  %v2631_v9 = vadd.f32 %v2244_v56, %v3471_v43  ;;  %v712_v55 = vpop.f32.mrb[11].mxu1  ;;  %v1371_v29 = vmul.f32 %v2718_v11, %v3483_v30 }
 0x152   :  { %v2412_v15 = vpop.f32.mrb[10].mxu0  ;;  %2729 = vtanh.f32 %v2630_v14  ;;  %v2633_v32 = vadd.f32 %v3471_v43, %v712_v55  ;;  %v1395_v27 = vsel %vm1385_vm0, %v1372_v50, 0.0  ;;  %v2831_v50 = vmov 0   ;;  %v1434_v55 = vld [vmem:[%s3807_s1] sm:$0xff] }
 0x153   :  { %v1312_v23 = vpop.f32.mrb[11].mxu0  ;;  %v2720_v17 = vpop.eup %2719  ;;  %v2632_v26 = vadd.f32 %v2631_v9, %v2412_v15  ;;  %1387 = vadd.xlane.f32.xlu0 %v1386_v20  ;;  %1396 = vadd.xlane.f32.xlu1 %v1395_v27  ;;  %v1392_v54 = vsel %vm1385_vm0, %v1371_v29, 0.0  ;;  %v1435_v9 = vld [vmem:[%s3807_s1 + $0x8] sm:$0xff]  ;;  %vm1450_vm2 = vcmp.eq.f32.partialorder %v1434_v55, 0.0 }
 0x154   :  { %v2722_v42 = vpop.eup %2721  ;;  %v2634_v47 = vadd.f32 %v2633_v32, %v1312_v23  ;;  %v2247_v63 = vpop.f32.mrb[12].mxu1  ;;  %v1374_v16 = vmul.f32 %v2720_v17, %v3483_v30  ;;  %2710 = vset.pattern.permute.xlu1 %v2831_v50  ;;  %2709 = vset.pattern.permute.xlu0 %v2831_v50  ;;  %vm1451_vm1 = vcmp.eq.f32.partialorder %v1435_v9, 0.0  ;;  %v1437_v23 = vld [vmem:[%s3807_s1 + $0x18] sm:$0xff]  ;;  %v1436_v32 = vld [vmem:[%s3807_s1 + $0x10] sm:$0xff] }
 0x155   :  { %2731 = vtanh.f32 %v2632_v26  ;;  %v2635_v22 = vadd.f32 %v2247_v63, %v3471_v43  ;;  %v726_v53 = vpop.f32.mrb[13].mxu1  ;;  %v1373_v0 = vmul.f32 %v2722_v42, %v3483_v30  ;;  %vm1453_vm4 = vcmp.eq.f32.partialorder %v1437_v23, 0.0  ;;  %v1438_v26 = vld [vmem:[%s3807_s1 + $0x20] sm:$0xff] }
 0x156   :  { %v2415_v1 = vpop.f32.mrb[12].mxu0  ;;  %2733 = vtanh.f32 %v2634_v47  ;;  %v2637_v60 = vadd.f32 %v3471_v43, %v726_v53  ;;  %v1401_v8 = vsel %vm1385_vm0, %v1374_v16, 0.0  ;;  %vm1452_vm5 = vcmp.eq.f32.partialorder %v1436_v32, 0.0 }
 0x157   :  { %v1324_v40 = vpop.f32.mrb[13].mxu0  ;;  %v2724_v51 = vpop.eup %2723  ;;  %v2636_v34 = vadd.f32 %v2635_v22, %v2415_v1  ;;  %1393 = vadd.xlane.f32.xlu1 %v1392_v54  ;;  %v1398_v45 = vsel %vm1385_vm0, %v1373_v0, 0.0  ;;  %v1439_v22 = vld [vmem:[%s3807_s1 + $0x28] sm:$0xff]  ;;  %vm1454_vm6 = vcmp.eq.f32.partialorder %v1438_v26, 0.0  ;;  %v1440_v54 = vld [vmem:[%s3807_s1 + $0x30] sm:$0xff] }
 0x158   :  { %v2726_v58 = vpop.eup %2725  ;;  %v2638_v19 = vadd.f32 %v2637_v60, %v1324_v40  ;;  %1399 = vadd.xlane.f32.xlu0 %v1398_v45  ;;  %v2250_v21 = vpop.f32.mrb[14].mxu1  ;;  %v1376_v52 = vmul.f32 %v2724_v51, %v3483_v30  ;;  %vm1455_vm7 = vcmp.eq.f32.partialorder %v1439_v22, 0.0  ;;  %vm1456_vm8 = vcmp.eq.f32.partialorder %v1440_v54, 0.0 }
 0x159   :  { %2735 = vtanh.f32 %v2636_v34  ;;  %v2639_v38 = vadd.f32 %v2250_v21, %v3471_v43  ;;  %v740_v39 = vpop.f32.mrb[15].mxu1  ;;  %v1375_v46 = vmul.f32 %v2726_v58, %v3483_v30 }
 0x15a   :  { %v2418_v59 = vpop.f32.mrb[14].mxu0  ;;  %2737 = vtanh.f32 %v2638_v19  ;;  %v2641_v44 = vadd.f32 %v3471_v43, %v740_v39  ;;  %v1407_v3 = vsel %vm1385_vm0, %v1376_v52, 0.0  ;;  %v1441_v19 = vld [vmem:[%s3807_s1 + $0x38] sm:$0xff] }
 0x15b   :  { %v1336_v33 = vpop.f32.mrb[15].mxu0  ;;  %v2728_v41 = vpop.eup %2727  ;;  %v2640_v37 = vadd.f32 %v2639_v38, %v2418_v59  ;;  %1402 = vadd.xlane.f32.xlu1 %v1401_v8  ;;  %v1404_v7 = vsel %vm1385_vm0, %v1375_v46, 0.0  ;;  %v1442_v46 = vld [vmem:[%s3807_s1 + $0x40] sm:$0xff]  ;;  %vm1457_vm9 = vcmp.eq.f32.partialorder %v1441_v19, 0.0 }
 0x15c   :  { %v2730_v28 = vpop.eup %2729  ;;  %v2642_v31 = vadd.f32 %v2641_v44, %v1336_v33  ;;  %1405 = vadd.xlane.f32.xlu0 %v1404_v7  ;;  %v1378_v43 = vmul.f32 %v2728_v41, %v3483_v30  ;;  %vm1458_vm10 = vcmp.eq.f32.partialorder %v1442_v46, 0.0 }
 0x15d   :  { %2739 = vtanh.f32 %v2640_v37  ;;  %v1377_v4 = vmul.f32 %v2730_v28, %v3483_v30  ;;  %v1443_v28 = vld [vmem:[%s3807_s1 + $0x48] sm:$0xff] }
 0x15e   :  { %2741 = vtanh.f32 %v2642_v31  ;;  %v1413_v25 = vsel %vm1385_vm0, %v1378_v43, 0.0  ;;  %v1444_v31 = vld [vmem:[%s3807_s1 + $0x50] sm:$0xff]  ;;  %v1446_v43 = vld [vmem:[%s3807_s1 + $0x60] sm:$0xff]  ;;  %vm1459_vm11 = vcmp.eq.f32.partialorder %v1443_v28, 0.0 }
 0x15f   :  { %v2732_v62 = vpop.eup %2731  ;;  %1408 = vadd.xlane.f32.xlu1 %v1407_v3  ;;  %v1410_v12 = vsel %vm1385_vm0, %v1377_v4, 0.0  ;;  %v1445_v3 = vld [vmem:[%s3807_s1 + $0x58] sm:$0xff]  ;;  %vm1460_vm12 = vcmp.eq.f32.partialorder %v1444_v31, 0.0  ;;  %vm1462_vm14 = vcmp.eq.f32.partialorder %v1446_v43, 0.0 }
 0x160   :  { %v2734_v24 = vpop.eup %2733  ;;  %1411 = vadd.xlane.f32.xlu0 %v1410_v12  ;;  %v1380_v61 = vmul.f32 %v2732_v62, %v3483_v30  ;;  %vm1461_vm13 = vcmp.eq.f32.partialorder %v1445_v3, 0.0 }
 0x161   :  { %v1379_v2 = vmul.f32 %v2734_v24, %v3483_v30 }
 0x162   :  { %v1419_v48 = vsel %vm1385_vm0, %v1380_v61, 0.0  ;;  %v3596_v61 = vld [vmem:[%s3807_s1 + $0x68] sm:$0xff] }
 0x163   :  { %v2736_v35 = vpop.eup %2735  ;;  %1414 = vadd.xlane.f32.xlu1 %v1413_v25  ;;  %v1416_v10 = vsel %vm1385_vm0, %v1379_v2, 0.0  ;;  %vm1463_vm15 = vcmp.eq.f32.partialorder %v3596_v61, 0.0 }
 0x164   :  { %v2738_v36 = vpop.eup %2737  ;;  %1417 = vadd.xlane.f32.xlu0 %v1416_v10  ;;  %v1382_v49 = vmul.f32 %v2736_v35, %v3483_v30 }
 0x165   :  { %v1381_v13 = vmul.f32 %v2738_v36, %v3483_v30 }
 0x166   :  { %v1425_v11 = vsel %vm1385_vm0, %v1382_v49, 0.0 }
 0x167   :  { %v2740_v57 = vpop.eup %2739  ;;  %1420 = vadd.xlane.f32.xlu1 %v1419_v48  ;;  %v1422_v18 = vsel %vm1385_vm0, %v1381_v13, 0.0 }
 0x168   :  { %v2742_v5 = vpop.eup %2741  ;;  %1423 = vadd.xlane.f32.xlu0 %v1422_v18  ;;  %v1384_v14 = vmul.f32 %v2740_v57, %v3483_v30  ;;  %v3605_v57 = vld [vmem:[%s3807_s1 + $0x70] sm:$0xff]  ;;  %v3610_v18 = vld [vmem:[%s3807_s1 + $0x78] sm:$0xff] }
 0x169   :  { %v1383_v6 = vmul.f32 %v2742_v5, %v3483_v30 }
 0x16a   :  { %v1431_v15 = vsel %vm1385_vm0, %v1384_v14, 0.0 }
 0x16b   :  { %1426 = vadd.xlane.f32.xlu1 %v1425_v11  ;;  %v1428_v56 = vsel %vm1385_vm0, %v1383_v6, 0.0  ;;  %vm1464_vm0 = vcmp.eq.f32.partialorder %v3605_v57, 0.0 }
 0x16c   :  { %1429 = vadd.xlane.f32.xlu0 %v1428_v56 }
 0x16f   :  { %1432 = vadd.xlane.f32.xlu1 %v1431_v15 }
 0x1dc   :  { %v1391_v30 = vpop.xlane.xlu0 %1390 }
 0x1dd   :  { %v3535_v20 = vsel %vm1451_vm1, -1e+09, %v1391_v30  ;;  %vm1465_vm1 = vcmp.eq.f32.partialorder %v3610_v18, 0.0 }
 0x1de   :  { %v1484_v42 = vsel %vm1482_vm3, %v3535_v20, -inf }
 0x1e0   :  { %v1388_v27 = vpop.xlane.xlu0 %1387  ;;  %v1397_v29 = vpop.xlane.xlu1 %1396 }
 0x1e1   :  { %v3540_v17 = vsel %vm1450_vm2, -1e+09, %v1388_v27  ;;  %v3549_v1 = vsel %vm1453_vm4, -1e+09, %v1397_v29  ;;  %vm1859_vm2 = vcmask 1041409   ;;  %vm1863_vm4 = vcmask 1043459  }
 0x1e2   :  { %v1483_v47 = vsel %vm1482_vm3, %v3540_v17, -inf  ;;  %v1493_v16 = vsel %vm1482_vm3, %v3549_v1, -inf }
 0x1e3   :  { %v1485_v63 = vmax.f32 %v1483_v47, %v1484_v42 }
 0x1e4   :  { %v1394_v53 = vpop.xlane.xlu1 %1393 }
 0x1e5   :  { %v1486_v40 = vrot.slane %v1485_v63, 4  ;;  %v3554_v0 = vsel %vm1452_vm5, -1e+09, %v1394_v53  ;;  %v1400_v60 = vpop.xlane.xlu0 %1399  ;;  %vm1865_vm5 = vcmask 1044484  }
 0x1e6   :  { %v1492_v51 = vsel %vm1482_vm3, %v3554_v0, -inf  ;;  %v3563_v58 = vsel %vm1454_vm6, -1e+09, %v1400_v60  ;;  %vm1867_vm6 = vcmask 1045509  }
 0x1e7   :  { %v1487_v34 = vmax.f32 %v1485_v63, %v1486_v40  ;;  %v1494_v45 = vmax.f32 %v1492_v51, %v1493_v16  ;;  %v1501_v44 = vsel %vm1482_vm3, %v3563_v58, -inf }
 0x1e8   :  { %v1403_v59 = vpop.xlane.xlu1 %1402 }
 0x1e9   :  { %v1488_v21 = vrot.slane %v1487_v34, 2  ;;  %v1495_v38 = vrot.slane %v1494_v45, 4  ;;  %v3568_v39 = vsel %vm1455_vm7, -1e+09, %v1403_v59  ;;  %v1406_v33 = vpop.xlane.xlu0 %1405  ;;  %vm1869_vm7 = vcmask 1046534  }
 0x1ea   :  { %v1502_v8 = vsel %vm1482_vm3, %v3568_v39, -inf  ;;  %v3577_v7 = vsel %vm1456_vm8, -1e+09, %v1406_v33  ;;  %vm1871_vm8 = vcmask 1047559  }
 0x1eb   :  { %v1489_v52 = vmax.f32 %v1487_v34, %v1488_v21  ;;  %v1496_v41 = vmax.f32 %v1494_v45, %v1495_v38  ;;  %v1503_v37 = vmax.f32 %v1501_v44, %v1502_v8  ;;  %v1510_v35 = vsel %vm1482_vm3, %v3577_v7, -inf }
 0x1ec   :  { %v1409_v4 = vpop.xlane.xlu1 %1408 }
 0x1ed   :  { %v1490_v62 = vrot.slane %v1489_v52, 1  ;;  %v1497_v12 = vrot.slane %v1496_v41, 2  ;;  %v1504_v24 = vrot.slane %v1503_v37, 4  ;;  %v3591_v2 = vsel %vm1457_vm9, -1e+09, %v1409_v4  ;;  %v1412_v25 = vpop.xlane.xlu0 %1411 }
 0x1ee   :  { %v1511_v10 = vsel %vm1482_vm3, %v3591_v2, -inf  ;;  %v3613_v5 = vsel %vm1458_vm10, -1e+09, %v1412_v25 }
 0x1ef   :  { %v1491_v36 = vmax.f32 %v1489_v52, %v1490_v62  ;;  %v1498_v13 = vmax.f32 %v1496_v41, %v1497_v12  ;;  %v1505_v48 = vmax.f32 %v1503_v37, %v1504_v24  ;;  %v1512_v49 = vmax.f32 %v1510_v35, %v1511_v10 }
 0x1f0   :  { %v1415_v6 = vpop.xlane.xlu1 %1414 }
 0x1f1   :  { %v1555_v11 = vsub.f32 %v3540_v17, %v1491_v36  ;;  %v1556_v14 = vsub.f32 %v3535_v20, %v1491_v36  ;;  %v1499_v56 = vrot.slane %v1498_v13, 1  ;;  %v1506_v15 = vrot.slane %v1505_v48, 2  ;;  %v1418_v50 = vpop.xlane.xlu0 %1417 }
 0x1f2   :  { %v1513_v9 = vrot.slane %v1512_v49, 4  ;;  %v3619_v55 = vsel %vm1459_vm11, -1e+09, %v1415_v6  ;;  %v3622_v30 = vsel %vm1460_vm12, -1e+09, %v1418_v50  ;;  %v1519_v20 = vsel %vm1482_vm3, %v3613_v5, -inf }
 0x1f3   :  { %v1571_v23 = vmul.f32 1.442695, %v1555_v11  ;;  %v1573_v32 = vmul.f32 1.442695, %v1556_v14  ;;  %v1500_v27 = vmax.f32 %v1498_v13, %v1499_v56  ;;  %v1507_v29 = vmax.f32 %v1505_v48, %v1506_v15 }
 0x1f4   :  { %v1514_v17 = vmax.f32 %v1512_v49, %v1513_v9  ;;  %v1520_v26 = vsel %vm1482_vm3, %v3619_v55, -inf  ;;  %v1528_v42 = vsel %vm1482_vm3, %v3622_v30, -inf  ;;  %v1421_v47 = vpop.xlane.xlu1 %1420 }
 0x1f5   :  { %2743 = vpow2.f32 %v1571_v23  ;;  %v1557_v63 = vsub.f32 %v3554_v0, %v1500_v27  ;;  %v1558_v22 = vsub.f32 %v3549_v1, %v1500_v27  ;;  %v1508_v53 = vrot.slane %v1507_v29, 1  ;;  %v1424_v40 = vpop.xlane.xlu0 %1423 }
 0x1f6   :  { %2745 = vpow2.f32 %v1573_v32  ;;  %v1515_v60 = vrot.slane %v1514_v17, 2  ;;  %v1521_v54 = vmax.f32 %v1519_v20, %v1520_v26  ;;  %v3635_v16 = vsel %vm1461_vm13, -1e+09, %v1421_v47 }
 0x1f7   :  { %v1575_v51 = vmul.f32 1.442695, %v1557_v63  ;;  %v1577_v34 = vmul.f32 1.442695, %v1558_v22  ;;  %v1509_v45 = vmax.f32 %v1507_v29, %v1508_v53  ;;  %v1529_v19 = vsel %vm1482_vm3, %v3635_v16, -inf }
 0x1f8   :  { %v1516_v59 = vmax.f32 %v1514_v17, %v1515_v60  ;;  %v1522_v21 = vrot.slane %v1521_v54, 4  ;;  %v1530_v38 = vmax.f32 %v1528_v42, %v1529_v19  ;;  %v3640_v0 = vsel %vm1462_vm14, -1e+09, %v1424_v40  ;;  %v1427_v1 = vpop.xlane.xlu1 %1426 }
 0x1f9   :  { %2747 = vpow2.f32 %v1575_v51  ;;  %v1559_v33 = vsub.f32 %v3563_v58, %v1509_v45  ;;  %v1560_v46 = vsub.f32 %v3568_v39, %v1509_v45  ;;  %v1537_v44 = vsel %vm1482_vm3, %v3640_v0, -inf  ;;  %v1430_v37 = vpop.xlane.xlu0 %1429 }
 0x1fa   :  { %2749 = vpow2.f32 %v1577_v34  ;;  %v1517_v8 = vrot.slane %v1516_v59, 1  ;;  %v1523_v52 = vmax.f32 %v1521_v54, %v1522_v21  ;;  %v1531_v41 = vrot.slane %v1530_v38, 4 }
 0x1fb   :  { %v1579_v28 = vmul.f32 1.442695, %v1559_v33  ;;  %v1581_v31 = vmul.f32 1.442695, %v1560_v46  ;;  %v3648_v4 = vsel %vm1463_vm15, -1e+09, %v1427_v1 }
 0x1fc   :  { %v1518_v3 = vmax.f32 %v1516_v59, %v1517_v8  ;;  %v1524_v43 = vrot.slane %v1523_v52, 2  ;;  %v1532_v62 = vmax.f32 %v1530_v38, %v1531_v41  ;;  %v1538_v58 = vsel %vm1482_vm3, %v3648_v4, -inf  ;;  %v1433_v39 = vpop.xlane.xlu1 %1432 }
 0x1fd   :  { %2751 = vpow2.f32 %v1579_v28  ;;  %v1539_v12 = vmax.f32 %v1537_v44, %v1538_v58  ;;  %v3654_v24 = vsel %vm1464_vm0, -1e+09, %v1430_v37  ;;  %v3658_v25 = vsel %vm1465_vm1, -1e+09, %v1433_v39 }
 0x1fe   :  { %2753 = vpow2.f32 %v1581_v31  ;;  %v1561_v61 = vsub.f32 %v3577_v7, %v1518_v3  ;;  %v1562_v35 = vsub.f32 %v3591_v2, %v1518_v3  ;;  %v1525_v10 = vmax.f32 %v1523_v52, %v1524_v43 }
 0x1ff   :  { %v3662_v36 = vpop.eup %2743  ;;  %v1533_v13 = vrot.slane %v1532_v62, 2  ;;  %v1540_v48 = vrot.slane %v1539_v12, 4  ;;  %v1546_v49 = vsel %vm1482_vm3, %v3654_v24, -inf  ;;  %v1547_v57 = vsel %vm1482_vm3, %v3658_v25, -inf }
 0x200   :  { %v3668_v6 = vpop.eup %2745  ;;  %v1603_v18 = vsel %vm1482_vm3, %v3662_v36, 0.0  ;;  %v1583_v11 = vmul.f32 1.442695, %v1561_v61  ;;  %v1585_v7 = vmul.f32 1.442695, %v1562_v35  ;;  %v1526_v14 = vrot.slane %v1525_v10, 1 }
 0x201   :  { %v1604_v2 = vsel %vm1482_vm3, %v3668_v6, 0.0  ;;  %v1534_v56 = vmax.f32 %v1532_v62, %v1533_v13  ;;  %v1541_v15 = vmax.f32 %v1539_v12, %v1540_v48  ;;  %v1548_v50 = vmax.f32 %v1546_v49, %v1547_v57 }
 0x202   :  { %v1605_v9 = vadd.f32 %v1604_v2, %v1603_v18  ;;  %2755 = vpow2.f32 %v1583_v11  ;;  %v1527_v23 = vmax.f32 %v1525_v10, %v1526_v14 }
 0x203   :  { %v3674_v32 = vpop.eup %2747  ;;  %2757 = vpow2.f32 %v1585_v7  ;;  %v1535_v27 = vrot.slane %v1534_v56, 1  ;;  %v1542_v29 = vrot.slane %v1541_v15, 2  ;;  %v1549_v17 = vrot.slane %v1548_v50, 4 }
 0x204   :  { %v3676_v20 = vpop.eup %2749  ;;  %v1606_v26 = vrot.slane %v1605_v9, 4  ;;  %v1612_v42 = vsel %vm1482_vm3, %v3674_v32, 0.0  ;;  %v1563_v47 = vsub.f32 %v3613_v5, %v1527_v23  ;;  %v1564_v63 = vsub.f32 %v3619_v55, %v1527_v23 }
 0x205   :  { %v1613_v22 = vsel %vm1482_vm3, %v3676_v20, 0.0  ;;  %v1536_v53 = vmax.f32 %v1534_v56, %v1535_v27  ;;  %v1543_v40 = vmax.f32 %v1541_v15, %v1542_v29  ;;  %v1550_v60 = vmax.f32 %v1548_v50, %v1549_v17 }
 0x206   :  { %v1607_v54 = vadd.f32 %v1606_v26, %v1605_v9  ;;  %v1614_v51 = vadd.f32 %v1613_v22, %v1612_v42  ;;  %v1587_v34 = vmul.f32 1.442695, %v1563_v47  ;;  %v1589_v45 = vmul.f32 1.442695, %v1564_v63 }
 0x207   :  { %v3684_v19 = vpop.eup %2751  ;;  %v1565_v59 = vsub.f32 %v3622_v30, %v1536_v53  ;;  %v1566_v21 = vsub.f32 %v3635_v16, %v1536_v53  ;;  %v1544_v38 = vrot.slane %v1543_v40, 1  ;;  %v1551_v5 = vrot.slane %v1550_v60, 2 }
 0x208   :  { %v3688_v1 = vpop.eup %2753  ;;  %v1608_v55 = vrot.slane %v1607_v54, 2  ;;  %v1615_v33 = vrot.slane %v1614_v51, 4  ;;  %v1621_v46 = vsel %vm1482_vm3, %v3684_v19, 0.0  ;;  %2759 = vpow2.f32 %v1587_v34 }
 0x209   :  { %v1622_v44 = vsel %vm1482_vm3, %v3688_v1, 0.0  ;;  %2761 = vpow2.f32 %v1589_v45  ;;  %v1591_v8 = vmul.f32 1.442695, %v1565_v59  ;;  %v1593_v52 = vmul.f32 1.442695, %v1566_v21 }
 0x20a   :  { %v1616_v41 = vadd.f32 %v1615_v33, %v1614_v51  ;;  %v1623_v30 = vadd.f32 %v1622_v44, %v1621_v46  ;;  %v1545_v37 = vmax.f32 %v1543_v40, %v1544_v38  ;;  %v1552_v16 = vmax.f32 %v1550_v60, %v1551_v5 }
 0x20b   :  { %2763 = vpow2.f32 %v1591_v8  ;;  %v1609_v28 = vadd.f32 %v1608_v55, %v1607_v54 }
 0x20c   :  { %v3694_v31 = vpop.eup %2755  ;;  %v1617_v3 = vrot.slane %v1616_v41, 2  ;;  %v1624_v43 = vrot.slane %v1623_v30, 4  ;;  %2765 = vpow2.f32 %v1593_v52  ;;  %v1567_v62 = vsub.f32 %v3640_v0, %v1545_v37 }
 0x20d   :  { %v3697_v58 = vpop.eup %2757  ;;  %v1630_v39 = vsel %vm1482_vm3, %v3694_v31, 0.0  ;;  %v1568_v12 = vsub.f32 %v3648_v4, %v1545_v37  ;;  %v1553_v61 = vrot.slane %v1552_v16, 1  ;;  %v1610_v35 = vrot.slane %v1609_v28, 1 }
 0x20e   :  { %v1625_v10 = vadd.f32 %v1624_v43, %v1623_v30  ;;  %v1631_v13 = vsel %vm1482_vm3, %v3697_v58, 0.0  ;;  %v1595_v48 = vmul.f32 1.442695, %v1567_v62  ;;  %v1618_v49 = vadd.f32 %v1617_v3, %v1616_v41 }
 0x20f   :  { %v1632_v57 = vadd.f32 %v1631_v13, %v1630_v39  ;;  %v1597_v18 = vmul.f32 1.442695, %v1568_v12  ;;  %v1554_v11 = vmax.f32 %v1552_v16, %v1553_v61  ;;  %v1611_v7 = vadd.f32 %v1610_v35, %v1609_v28 }
 0x210   :  { %v1626_v0 = vrot.slane %v1625_v10, 2  ;;  %2767 = vpow2.f32 %v1595_v48  ;;  %v1619_v14 = vrot.slane %v1618_v49, 1 }
 0x211   :  { %v1633_v2 = vrot.slane %v1632_v57, 4  ;;  %2769 = vpow2.f32 %v1597_v18  ;;  %v1569_v56 = vsub.f32 %v3654_v24, %v1554_v11  ;;  %v1570_v4 = vsub.f32 %v3658_v25, %v1554_v11 }
 0x212   :  { %v3706_v15 = vpop.eup %2759  ;;  %2771 = vrcp.f32 %v1611_v7  ;;  %v1620_v50 = vadd.f32 %v1619_v14, %v1618_v49  ;;  %v1627_v9 = vadd.f32 %v1626_v0, %v1625_v10 }
 0x213   :  { %v3708_v23 = vpop.eup %2761  ;;  %v1634_v27 = vadd.f32 %v1633_v2, %v1632_v57  ;;  %v1639_v29 = vsel %vm1482_vm3, %v3706_v15, 0.0  ;;  %v1599_v17 = vmul.f32 1.442695, %v1569_v56  ;;  %v1601_v26 = vmul.f32 1.442695, %v1570_v4 }
 0x214   :  { %v1640_v42 = vsel %vm1482_vm3, %v3708_v23, 0.0  ;;  %2773 = vrcp.f32 %v1620_v50  ;;  %v1628_v24 = vrot.slane %v1627_v9, 1 }
 0x215   :  { %v3714_v47 = vpop.eup %2763  ;;  %v1635_v25 = vrot.slane %v1634_v27, 2  ;;  %v1641_v63 = vadd.f32 %v1640_v42, %v1639_v29  ;;  %2775 = vpow2.f32 %v1599_v17 }
 0x216   :  { %v3716_v22 = vpop.eup %2765  ;;  %v1648_v53 = vsel %vm1482_vm3, %v3714_v47, 0.0  ;;  %2777 = vpow2.f32 %v1601_v26  ;;  %v1629_v51 = vadd.f32 %v1628_v24, %v1627_v9 }
 0x217   :  { %v1642_v40 = vrot.slane %v1641_v63, 4  ;;  %v1649_v60 = vsel %vm1482_vm3, %v3716_v22, 0.0  ;;  %v1636_v34 = vadd.f32 %v1635_v25, %v1634_v27 }
 0x218   :  { %v1650_v54 = vadd.f32 %v1649_v60, %v1648_v53  ;;  %2779 = vrcp.f32 %v1629_v51 }
 0x219   :  { %v1643_v45 = vadd.f32 %v1642_v40, %v1641_v63  ;;  %v1637_v8 = vrot.slane %v1636_v34, 1 }
 0x21a   :  { %v3722_v59 = vpop.eup %2767  ;;  %v1651_v21 = vrot.slane %v1650_v54, 4 }
 0x21b   :  { %v3724_v38 = vpop.eup %2769  ;;  %v1644_v5 = vrot.slane %v1643_v45, 2  ;;  %v1657_v55 = vsel %vm1482_vm3, %v3722_v59, 0.0  ;;  %v1638_v35 = vadd.f32 %v1637_v8, %v1636_v34 }
 0x21c   :  { %v2772_v33 = vpop.eup %2771  ;;  %v1652_v46 = vadd.f32 %v1651_v21, %v1650_v54  ;;  %v1658_v44 = vsel %vm1482_vm3, %v3724_v38, 0.0 }
 0x21d   :  { %v1659_v52 = vadd.f32 %v1658_v44, %v1657_v55  ;;  %v1677_v41 = vmul.f32 %v2772_v33, %v3668_v6  ;;  %v1676_v30 = vmul.f32 %v2772_v33, %v3662_v36  ;;  %v1645_v37 = vadd.f32 %v1644_v5, %v1643_v45  ;;  %v2793_v33 = vld [vmem:[%s3806_s0] sm:$0xff]  ;;  %v2794_v44 = vld [vmem:[%s3806_s0 + $0x28] sm:$0xff] }
 0x21e   :  { %v2774_v16 = vpop.eup %2773  ;;  %v1653_v28 = vrot.slane %v1652_v46, 2 }
 0x21f   :  { %v2776_v3 = vpop.eup %2775  ;;  %v1660_v43 = vrot.slane %v1659_v52, 4  ;;  %1706 = vperm.xlu1 %2710, %v1677_v41   ;;  %1701 = vperm.xlu0 %2709, %v1676_v30   ;;  %v1679_v62 = vmul.f32 %v2774_v16, %v3674_v32  ;;  %v1646_v39 = vrot.slane %v1645_v37, 1  ;;  %v1680_v32 = vmul.f32 %v2774_v16, %v3676_v20  ;;  %v2795_v41 = vld [vmem:[%s3806_s0 + $0x10] sm:$0xff] }
 0x220   :  { %v2778_v12 = vpop.eup %2777  ;;  %v1666_v61 = vsel %vm1482_vm3, %v2776_v3, 0.0  ;;  %v1654_v10 = vadd.f32 %v1653_v28, %v1652_v46 }
 0x221   :  { %v1661_v13 = vadd.f32 %v1660_v43, %v1659_v52  ;;  %v1667_v6 = vsel %vm1482_vm3, %v2778_v12, 0.0  ;;  %v1647_v48 = vadd.f32 %v1646_v39, %v1645_v37  ;;  %v2796_v37 = vld [vmem:[%s3806_s0 + $0x20] sm:$0xff]  ;;  %v2797_v39 = vld [vmem:[%s3806_s0 + $0x30] sm:$0xff]  ;;  %vm1861_vm3 = vcmask 1042434  }
 0x222   :  { %v1668_v36 = vadd.f32 %v1667_v6, %v1666_v61  ;;  %v1655_v49 = vrot.slane %v1654_v10, 1  ;;  %v2780_v0 = vpop.eup %2779 }
 0x223   :  { %v1662_v57 = vrot.slane %v1661_v13, 2  ;;  %1711 = vperm.xlu1 %2710, %v1679_v62   ;;  %2781 = vrcp.f32 %v1647_v48  ;;  %v1682_v4 = vmul.f32 %v2780_v0, %v3684_v19  ;;  %v1683_v17 = vmul.f32 %v2780_v0, %v3688_v1 }
 0x224   :  { %v1669_v18 = vrot.slane %v1668_v36, 4  ;;  %2783 = vrcp.f32 %v1638_v35  ;;  %v1656_v11 = vadd.f32 %v1655_v49, %v1654_v10  ;;  %v2798_v35 = vld [vmem:[%s3806_s0 + $0x38] sm:$0xff] }
 0x225   :  { %v1663_v7 = vadd.f32 %v1662_v57, %v1661_v13  ;;  %v2799_v57 = vld [vmem:[%s3806_s0 + $0x48] sm:$0xff] }
 0x226   :  { %v1670_v14 = vadd.f32 %v1669_v18, %v1668_v36  ;;  %2785 = vrcp.f32 %v1656_v11 }
 0x227   :  { %1716 = vperm.xlu1 %2710, %v1680_v32   ;;  %v1664_v2 = vrot.slane %v1663_v7, 1  ;;  %v2800_v32 = vld [vmem:[%s3806_s0 + $0x40] sm:$0xff] }
 0x228   :  { %v1671_v56 = vrot.slane %v1670_v14, 2 }
 0x229   :  { %v1665_v50 = vadd.f32 %v1664_v2, %v1663_v7 }
 0x22a   :  { %v1672_v9 = vadd.f32 %v1671_v56, %v1670_v14 }
 0x22b   :  { %1721 = vperm.xlu1 %2710, %v1682_v4   ;;  %2787 = vrcp.f32 %v1665_v50 }
 0x22c   :  { %v1673_v27 = vrot.slane %v1672_v9, 1 }
 0x22d   :  { %v2782_v29 = vpop.eup %2781 }
 0x22e   :  { %v2784_v26 = vpop.eup %2783  ;;  %v1689_v20 = vmul.f32 %v2782_v29, %v3708_v23  ;;  %v1674_v42 = vadd.f32 %v1673_v27, %v1672_v9  ;;  %v1688_v1 = vmul.f32 %v2782_v29, %v3706_v15  ;;  %v2791_v15 = vld [vmem:[%s3806_s0 + $0x18] sm:$0xff] }
 0x22f   :  { %1726 = vperm.xlu1 %2710, %v1683_v17   ;;  %v1685_v25 = vmul.f32 %v2784_v26, %v3694_v31  ;;  %v1686_v53 = vmul.f32 %v2784_v26, %v3697_v58  ;;  %v2801_v9 = vld [vmem:[%s3806_s0 + $0x58] sm:$0xff]  ;;  %v2802_v26 = vld [vmem:[%s3806_s0 + $0x50] sm:$0xff] }
 0x230   :  { %v2786_v24 = vpop.eup %2785  ;;  %1746 = vperm.xlu0 %2709, %v1689_v20   ;;  %2789 = vrcp.f32 %v1674_v42 }
 0x231   :  { %v1692_v19 = vmul.f32 %v2786_v24, %v3716_v22  ;;  %v1691_v54 = vmul.f32 %v2786_v24, %v3714_v47  ;;  %v2792_v47 = vld [vmem:[%s3806_s0 + $0x8] sm:$0xff] }
 0x233   :  { %1731 = vperm.xlu1 %2710, %v1685_v25  }
 0x234   :  { %1756 = vperm.xlu0 %2709, %v1692_v19  }
 0x235   :  { %v2788_v63 = vpop.eup %2787 }
 0x236   :  { %v1695_v40 = vmul.f32 %v2788_v63, %v3724_v38  ;;  %v1694_v31 = vmul.f32 %v2788_v63, %v3722_v59 }
 0x237   :  { %1736 = vperm.xlu1 %2710, %v1686_v53  }
 0x238   :  { %1766 = vperm.xlu0 %2709, %v1695_v40  }
 0x23a   :  { %v2790_v23 = vpop.eup %2789 }
 0x23b   :  { %1741 = vperm.xlu1 %2710, %v1688_v1   ;;  %v1698_v60 = vmul.f32 %v2790_v23, %v2778_v12  ;;  %v1697_v22 = vmul.f32 %v2790_v23, %v2776_v3  ;;  %v2803_v1 = vld [vmem:[%s3806_s0 + $0x68] sm:$0xff] }
 0x23d   :  { %1776 = vperm.xlu0 %2709, %v1698_v60  }
 0x23f   :  { %1751 = vperm.xlu1 %2710, %v1691_v54  }
 0x243   :  { %1761 = vperm.xlu1 %2710, %v1694_v31   ;;  %v2804_v31 = vld [vmem:[%s3806_s0 + $0x60] sm:$0xff] }
 0x247   :  { %1771 = vperm.xlu1 %2710, %v1697_v22  }
 0x29e   :  { %v1707_v51 = vpop.permute.xlu1 %1706  ;;  %v1702_v21 = vpop.permute.xlu0 %1701 }
 0x29f   :  { %v1780_v59 = vmul.f32 %v2792_v47, %v1707_v51  ;;  %v1779_v46 = vmul.f32 %v2793_v33, %v1702_v21 }
 0x2a1   :  { %v1795_v3 = vadd.f32 %v1780_v59, %v1779_v46  ;;  %v2806_v46 = vld [vmem:[%s3806_s0 + $0x70] sm:$0xff] }
 0x2a2   :  { %v1712_v58 = vpop.permute.xlu1 %1711 }
 0x2a3   :  { %v1781_v30 = vmul.f32 %v2795_v41, %v1712_v58  ;;  %v1796_v48 = vrot.slane %v1795_v3, 4 }
 0x2a5   :  { %v1797_v56 = vadd.f32 %v1796_v48, %v1795_v3 }
 0x2a6   :  { %v1717_v34 = vpop.permute.xlu1 %1716 }
 0x2a7   :  { %v1782_v5 = vmul.f32 %v2791_v15, %v1717_v34  ;;  %v1798_v19 = vrot.slane %v1797_v56, 2  ;;  %v2805_v15 = vld [vmem:[%s3806_s0 + $0x78] sm:$0xff]  ;;  %s2832_s0 = smov [#allocation2]  }
 0x2a8   :  { %s1881_s13 = sshll.u32 %s2832_s0, 4  ;;  %s1882_s13 = int_to_ptr.vmem [resolvable:$true] %s1881_s13 }
 0x2a9   :  { %v1802_v28 = vadd.f32 %v1782_v5, %v1781_v30  ;;  %v1799_v21 = vadd.f32 %v1798_v19, %v1797_v56  ;;  %s2807_s14 = scalar_lea.vmem %s1882_s13, 128  ;;  %p2812_p1 = scmp.lt.s32.totalorder %s1882_s13, %s1882_s13 }
 0x2aa   :  { %v1722_v45 = vpop.permute.xlu1 %1721  ;;  %p2808_p0 = scmp.ne.s32.totalorder %s1882_s13, %s2807_s14  ;;  %p2813_p2 = scmp.lt.s32.totalorder %s2807_s14, %s2807_s14 }
 0x2ab   :  { %v1783_v16 = vmul.f32 %v2796_v37, %v1722_v45  ;;  %v1803_v13 = vrot.slane %v1802_v28, 4 }
 0x2ac   :  { %p2814_p3 = por %p2813_p2, %p2812_p1 }
 0x2ad   :  { %v1804_v0 = vadd.f32 %v1803_v13, %v1802_v28  ;;  %v1800_v28 = vrot.slane %v1799_v21, 1 }
 0x2ae   :  { %v1727_v38 = vpop.permute.xlu1 %1726  ;;  %p2815_p4 = pnand %p2814_p3, %p2808_p0 }
 0x2af   :  { %v1747_v55 = vpop.permute.xlu0 %1746  ;;  %v1784_v8 = vmul.f32 %v2794_v44, %v1727_v38  ;;  %v1805_v42 = vrot.slane %v1804_v0, 2 }
 0x2b0   :  { %v1788_v18 = vmul.f32 %v2799_v57, %v1747_v55 }
 0x2b1   :  { %v1809_v43 = vadd.f32 %v1784_v8, %v1783_v16  ;;  %v1806_v58 = vadd.f32 %v1805_v42, %v1804_v0 }
 0x2b2   :  { %v1732_v52 = vpop.permute.xlu1 %1731 }
 0x2b3   :  { %v1785_v12 = vmul.f32 %v2797_v39, %v1732_v52  ;;  %v1757_v61 = vpop.permute.xlu0 %1756  ;;  %v1810_v36 = vrot.slane %v1809_v43, 4  ;;  %v1807_v52 = vrot.slane %v1806_v58, 1 }
 0x2b4   :  { %v1790_v27 = vmul.f32 %v2801_v9, %v1757_v61 }
 0x2b5   :  { %v1811_v4 = vadd.f32 %v1810_v36, %v1809_v43 }
 0x2b6   :  { %v1737_v62 = vpop.permute.xlu1 %1736 }
 0x2b7   :  { %v1786_v10 = vmul.f32 %v2798_v35, %v1737_v62  ;;  %v1767_v14 = vpop.permute.xlu0 %1766  ;;  %v1812_v63 = vrot.slane %v1811_v4, 2 }
 0x2b8   :  { %v1792_v23 = vmul.f32 %v2803_v1, %v1767_v14 }
 0x2b9   :  { %v1816_v6 = vadd.f32 %v1786_v10, %v1785_v12  ;;  %v1813_v38 = vadd.f32 %v1812_v63, %v1811_v4  ;;  %v1808_v12 = vadd.f32 %v1807_v52, %v1806_v58 }
 0x2ba   :  { %v1742_v49 = vpop.permute.xlu1 %1741 }
 0x2bb   :  { %v1817_v11 = vrot.slane %v1816_v6, 4  ;;  %v1787_v7 = vmul.f32 %v2800_v32, %v1742_v49  ;;  %v1814_v16 = vrot.slane %v1813_v38, 1 }
 0x2bc   :  { %v1777_v60 = vpop.permute.xlu0 %1776 }
 0x2bd   :  { %v1823_v2 = vadd.f32 %v1788_v18, %v1787_v7  ;;  %v1818_v29 = vadd.f32 %v1817_v11, %v1816_v6  ;;  %v1794_v5 = vmul.f32 %v2805_v15, %v1777_v60  ;;  %v1815_v13 = vadd.f32 %v1814_v16, %v1813_v38 }
 0x2be   :  { %v1752_v50 = vpop.permute.xlu1 %1751  ;;  %v1801_v6 = vadd.f32 %v1800_v28, %v1799_v21 }
 0x2bf   :  { %v1824_v17 = vrot.slane %v1823_v2, 4  ;;  %v1789_v20 = vmul.f32 %v2802_v26, %v1752_v50  ;;  %v1819_v40 = vrot.slane %v1818_v29, 2 }
 0x2c0   :  { %v1860_v18 = vsel %vm1859_vm2, %v1808_v12, %v1801_v6 }
 0x2c1   :  { %v1825_v24 = vadd.f32 %v1824_v17, %v1823_v2  ;;  %v1830_v25 = vadd.f32 %v1790_v27, %v1789_v20  ;;  %v1820_v47 = vadd.f32 %v1819_v40, %v1818_v29  ;;  %v1862_v7 = vsel %vm1861_vm3, %v1815_v13, %v1860_v18 }
 0x2c2   :  { %v1762_v53 = vpop.permute.xlu1 %1761 }
 0x2c3   :  { %v1831_v54 = vrot.slane %v1830_v25, 4  ;;  %v1791_v22 = vmul.f32 %v2804_v31, %v1762_v53  ;;  %v1826_v51 = vrot.slane %v1825_v24, 2  ;;  %v1821_v3 = vrot.slane %v1820_v47, 1 }
 0x2c5   :  { %v1832_v34 = vadd.f32 %v1831_v54, %v1830_v25  ;;  %v1837_v45 = vadd.f32 %v1792_v23, %v1791_v22  ;;  %v1827_v8 = vadd.f32 %v1826_v51, %v1825_v24  ;;  %v1822_v48 = vadd.f32 %v1821_v3, %v1820_v47 }
 0x2c6   :  { %v1772_v55 = vpop.permute.xlu1 %1771 }
 0x2c7   :  { %v1833_v59 = vrot.slane %v1832_v34, 2  ;;  %v1838_v33 = vrot.slane %v1837_v45, 4  ;;  %v1793_v44 = vmul.f32 %v2806_v46, %v1772_v55  ;;  %v1828_v39 = vrot.slane %v1827_v8, 1 }
 0x2c8   :  { %v1864_v2 = vsel %vm1863_vm4, %v1822_v48, %v1862_v7 }
 0x2c9   :  { %v1834_v41 = vadd.f32 %v1833_v59, %v1832_v34  ;;  %v1839_v30 = vadd.f32 %v1838_v33, %v1837_v45  ;;  %v1844_v37 = vadd.f32 %v1794_v5, %v1793_v44  ;;  %v1829_v57 = vadd.f32 %v1828_v39, %v1827_v8 }
 0x2cb   :  { %v1840_v43 = vrot.slane %v1839_v30, 2  ;;  %v1845_v62 = vrot.slane %v1844_v37, 4  ;;  %v1835_v61 = vrot.slane %v1834_v41, 1  ;;  %v1866_v56 = vsel %vm1865_vm5, %v1829_v57, %v1864_v2 }
 0x2cd   :  { %v1841_v35 = vadd.f32 %v1840_v43, %v1839_v30  ;;  %v1846_v10 = vadd.f32 %v1845_v62, %v1844_v37  ;;  %v1836_v11 = vadd.f32 %v1835_v61, %v1834_v41 }
 0x2cf   :  { %v1842_v36 = vrot.slane %v1841_v35, 1  ;;  %v1847_v49 = vrot.slane %v1846_v10, 2  ;;  %v1868_v50 = vsel %vm1867_vm6, %v1836_v11, %v1866_v56 }
 0x2d1   :  { %v1848_v32 = vadd.f32 %v1847_v49, %v1846_v10  ;;  %v1843_v0 = vadd.f32 %v1842_v36, %v1841_v35 }
 0x2d3   :  { %v1849_v14 = vrot.slane %v1848_v32, 1  ;;  %v1870_v9 = vsel %vm1869_vm7, %v1843_v0, %v1868_v50 }
 0x2d5   :  { %v1850_v4 = vadd.f32 %v1849_v14, %v1848_v32 }
 0x2d7   :  { %v1872_v27 = vsel %vm1871_vm8, %v1850_v4, %v1870_v9 }
 0x2d8   :  { %1874 = vst [vmem:[#allocation2] sm:$0xff] %v1872_v27 }
 0x2d9   :  { %2818 = shalt.err (!%p2815_p4)
}
 0x2da   :  { %s2819_s17 = scalar_lea.hbm %s3811_s5, 128 }
 0x2db   :  { %p2820_p5 = scmp.ne.s32.totalorder %s3811_s5, %s2819_s17  ;;  %p2823_p6 = scmp.lt.u32.totalorder %s2819_s17, %s3811_s5 }
 0x2dd   :  { %p2825_p7 = pnand %p2823_p6, %p2820_p5 }
 0x2df   :  { %2828 = shalt.err (!%p2825_p7)
}
 0x2e0   :  { %1884 = dma.vmem_to_hbm [thread:$0]  %s1882_s13, 128, %s3811_s5, [#allocation3]  }
 0x2e1   :  { %2829 = dma.done.wait [#allocation3], 128  }
 0x2e2   :  { %2830 = vsyncadd [#allocation3], 4294967168 }
 0x2e3   :  { %1888 = vsyncpa [#allocation3], 1 }

</bundles_post_ra>
